<compile_context>
chip_gen: v5e
topology: v5e:2x2
jax: 0.10.0
libtpu: 0.0.40
codegen_flags: <defaults>
</compile_context>

<pallas_src>
import functools
import math

import jax
import jax.numpy as jnp
from jax import lax
from jax.experimental import pallas as pl
from jax.experimental.pallas import tpu as pltpu


# ----------------------------------------------------------------------------------
# Static slab -> parity bookkeeping.
# Slab (r, j), r/j in {0,1,2}, holds x[h + r - 1, w + j - 1] (zero outside the image).
# Parity (pi, pj) consumes slab (r, j) iff r in {pi, pi+1} and j in {pj, pj+1}; the
# effective-weight tap it uses is (t, u) = (r - pi, j - pj).
# ----------------------------------------------------------------------------------
_PAD_ROWS = 8                                  # extra zero pixel-rows before/after
_CORNER_SLABS = ((0, 0), (0, 2), (2, 0), (2, 2))   # 1 consumer each  -> [C, C]
_EDGE_SLABS = ((0, 1), (2, 1), (1, 0), (1, 2))     # 2 consumers each -> [C, 2C]
_CENTER_SLAB = (1, 1)                              # 4 consumers      -> [C, 4C]


def _consumers(r, j):
    pis = (0,) if r == 0 else ((1,) if r == 2 else (0, 1))
    pjs = (0,) if j == 0 else ((1,) if j == 2 else (0, 1))
    return tuple((pi, pj) for pi in pis for pj in pjs)


_CORNER_PAR = tuple(2 * _consumers(r, j)[0][0] + _consumers(r, j)[0][1]
                    for (r, j) in _CORNER_SLABS)
_EDGE_PAR = tuple(tuple(2 * pi + pj for (pi, pj) in _consumers(r, j))
                  for (r, j) in _EDGE_SLABS)
_CENTER_PAR = tuple(2 * pi + pj for (pi, pj) in _consumers(*_CENTER_SLAB))


def upsample_conv_kernel(x_ref, wc_ref, we_ref, wm_ref, b_ref, o_ref, *, H, W):
    """One grid step == one batch element.

    x_ref  : [1, P + (H+2)*W + P, C]  f32, H-halo-padded image flattened to one pixel
                                      per sublane row, plus P extra zero rows each side.
    wc_ref : [4, C, C]      bf16 effective weights for the 4 corner slabs.
    we_ref : [4, C, 2C]     bf16, per edge slab the 2 consuming parities concatenated on N.
    wm_ref : [C, 4C]        bf16, centre slab, all 4 parities concatenated on N.
    b_ref  : [1, C]         f32 bias.
    o_ref  : [1, 4, H*W, C] per-parity outputs, parity p = 2*pi + pj.
    """
    S = (H + 2) * W
    C = x_ref.shape[-1]
    P = _PAD_ROWS

    # Column-shifted views derived from the single input: static offset loads replace
    # the three shifted HBM copies; masks zero the wrapped W-boundary columns.
    xc = x_ref[0, P:P + S, :]                     # centre columns (aligned load)
    xl = x_ref[0, P - 1:P - 1 + S, :]             # left neighbour  (w - 1)
    xr = x_ref[0, P + 1:P + 1 + S, :]             # right neighbour (w + 1)
    col = lax.broadcasted_iota(jnp.int32, (S, 1), 0) % W
    xl = jnp.where(col == 0, 0.0, xl)
    xr = jnp.where(col == W - 1, 0.0, xr)
    # bf16 operands for the MXU; accumulation stays f32.
    xs = (xl.astype(jnp.bfloat16), xc.astype(jnp.bfloat16), xr.astype(jnp.bfloat16))

    def slab(r, j):                                # [H*W, C], static sublane-aligned slice
        return xs[j][r * W:(r + H) * W, :]

    acc = [None, None, None, None]                 # f32 parity accumulators

    # Centre slab feeds all four parities: one [HW,C] @ [C,4C] MXU pass initializes acc.
    res = jnp.dot(slab(*_CENTER_SLAB), wm_ref[...], preferred_element_type=jnp.float32)
    for idx, p in enumerate(_CENTER_PAR):
        acc[p] = res[:, idx * C:(idx + 1) * C]

    # Edge slabs feed two parities each: [HW,C] @ [C,2C]; slice-adds land on the VPU.
    for e, (r, j) in enumerate(_EDGE_SLABS):
        res = jnp.dot(slab(r, j), we_ref[e], preferred_element_type=jnp.float32)
        for idx, p in enumerate(_EDGE_PAR[e]):
            acc[p] = acc[p] + res[:, idx * C:(idx + 1) * C]

    # Corner slabs feed one parity each: [HW,C] @ [C,C].
    for cidx, (r, j) in enumerate(_CORNER_SLABS):
        p = _CORNER_PAR[cidx]
        acc[p] = acc[p] + jnp.dot(slab(r, j), wc_ref[cidx],
                                  preferred_element_type=jnp.float32)

    bias = b_ref[...]                              # [1, C] f32
    for p in range(4):
        o_ref[0, p] = (acc[p] + bias).astype(o_ref.dtype)


def _pack_effective_weights(weight):
    """Fold the nearest-2x upsample into the 3x3 conv and regroup weights per slab.

    weight: [C_out, C_in, 3, 3] (PyTorch OIHW), any float dtype.
    Returns (w_corner [4,C,C], w_edge [4,C,2C], w_center [C,4C]) in bf16, with the
    tap sums done in f32 and pre-transposed so the kernel computes x @ W directly.
    """
    # original kernel rows ki feeding effective tap t of parity pi (same for columns)
    sel = {(0, 0): (0,), (0, 1): (1, 2), (1, 0): (0, 1), (1, 1): (2,)}
    w = weight.astype(jnp.float32)

    def eff(pi, pj, t, u):                          # [C_in, C_out], f32
        blk = None
        for ki in sel[(pi, t)]:
            for kj in sel[(pj, u)]:
                term = w[:, :, ki, kj]
                blk = term if blk is None else blk + term
        return blk.T

    def pack(r, j):                                 # concat consuming parities along N
        mats = [eff(pi, pj, r - pi, j - pj) for (pi, pj) in _consumers(r, j)]
        return jnp.concatenate(mats, axis=1)

    w_corner = jnp.stack([pack(r, j) for (r, j) in _CORNER_SLABS]).astype(jnp.bfloat16)
    w_edge = jnp.stack([pack(r, j) for (r, j) in _EDGE_SLABS]).astype(jnp.bfloat16)
    w_center = pack(*_CENTER_SLAB).astype(jnp.bfloat16)
    return w_corner, w_edge, w_center


@jax.jit
def upsample_conv(x_nchw, weight, bias):
    B, C, H, W = x_nchw.shape
    HW = H * W
    S = (H + 2) * W
    P = _PAD_ROWS

    # Channels-last + flatten spatial; ONE pad provides both the H halo (W zero
    # pixel-rows top/bottom) and the P extra rows used for the in-kernel +/-1 column
    # shifts.  Wrapper prep is a single transpose + a single pad.
    xflat = jnp.transpose(x_nchw, (0, 2, 3, 1)).reshape(B, HW, C)
    xflat = jnp.pad(xflat, ((0, 0), (P + W, P + W), (0, 0)))     # [B, P+S+P, C]

    w_corner, w_edge, w_center = _pack_effective_weights(weight)  # bf16
    b2 = bias.reshape(1, C).astype(jnp.float32)

    kernel = functools.partial(upsample_conv_kernel, H=H, W=W)
    flops = 2 * B * 16 * HW * C * C
    bytes_accessed = (4 * B * (S + 2 * P) * C          # f32 input
                      + 2 * 16 * C * C + 4 * C          # bf16 weights + f32 bias
                      + 4 * B * 4 * HW * C)             # f32 output

    out4 = pl.pallas_call(
        kernel,
        out_shape=jax.ShapeDtypeStruct((B, 4, HW, C), x_nchw.dtype),
        grid_spec=pltpu.PrefetchScalarGridSpec(
            num_scalar_prefetch=0,
            grid=(B,),
            in_specs=[
                pl.BlockSpec((1, S + 2 * P, C), lambda b: (b, 0, 0)),
                pl.BlockSpec((4, C, C), lambda b: (0, 0, 0)),        # constant weights
                pl.BlockSpec((4, C, 2 * C), lambda b: (0, 0, 0)),
                pl.BlockSpec((C, 4 * C), lambda b: (0, 0)),
                pl.BlockSpec((1, C), lambda b: (0, 0)),              # constant bias
            ],
            out_specs=pl.BlockSpec((1, 4, HW, C), lambda b: (b, 0, 0, 0)),
        ),
        compiler_params=pltpu.CompilerParams(
            dimension_semantics=("parallel",),
            vmem_limit_bytes=48 * 1024 * 1024),
        cost_estimate=pl.CostEstimate(flops=flops, transcendentals=0,
                                      bytes_accessed=bytes_accessed),
    )(xflat, w_corner, w_edge, w_center, b2)

    # out4[b, 2*pi+pj, h*W + w, c] == y[b, c, 2h+pi, 2w+pj]; interleave parities and
    # return NCHW as the PyTorch module does (single fused transpose; keep NHWC if a
    # downstream consumer is channels-last).
    y = out4.reshape(B, 2, 2, H, W, C).transpose(0, 5, 3, 1, 4, 2)
    return y.reshape(B, C, 2 * H, 2 * W)


def ref_forward(x, weight, bias):
    """Pure-JAX f32 reference mirroring the PyTorch forward (nearest-2x, then conv3x3)."""
    B, C, H, W = x.shape
    up = jnp.repeat(jnp.repeat(x, 2, axis=2), 2, axis=3)             # nearest, [B,C,2H,2W]
    upp = jnp.pad(up, ((0, 0), (0, 0), (1, 1), (1, 1)))
    out = jnp.zeros((B, weight.shape[0], 2 * H, 2 * W), jnp.float32)
    for ki in range(3):
        for kj in range(3):
            patch = upp[:, :, ki:ki + 2 * H, kj:kj + 2 * W]          # [B, C_in, 2H, 2W]
            out = out + jnp.einsum("bihw,oi->bohw", patch, weight[:, :, ki, kj])
    return out + bias[None, :, None, None]


if __name__ == "__main__":
    key = jax.random.PRNGKey(0)
    kx, kw, kb = jax.random.split(key, 3)

    batch, channels, height, width = 2, 128, 8, 8
    x = jax.random.normal(kx, (batch, channels, height, width), jnp.float32)

    fan_in = channels * 3 * 3
    bound = 1.0 / math.sqrt(fan_in)                                  # PyTorch-like init
    weight = jax.random.uniform(kw, (channels, channels, 3, 3), jnp.float32, -bound, bound)
    bias = jax.random.uniform(kb, (channels,), jnp.float32, -bound, bound)

    out = upsample_conv(x, weight, bias)
    out = jax.block_until_ready(out)

    ref = ref_forward(x, weight, bias)
    assert out.shape == (batch, channels, 2 * height, 2 * width) and out.dtype == x.dtype
    # bf16 MXU operands (f32 accumulation): tolerance loosened vs the f32 reference.
    assert jnp.allclose(out, ref, rtol=2e-2, atol=2e-2), "mismatch vs reference"
    print("KERNEL_OK")
</pallas_src>

<mosaic_0001>
module attributes {stable_mosaic.version = 11 : i64} {
  func.func @upsample_conv_kernel(%arg0: i32, %arg1: memref<1x96x128xf32, #tpu.memory_space<vmem>>, %arg2: memref<4x128x128xbf16, #tpu.memory_space<vmem>>, %arg3: memref<4x128x256xbf16, #tpu.memory_space<vmem>>, %arg4: memref<128x512xbf16, #tpu.memory_space<vmem>>, %arg5: memref<1x128xf32, #tpu.memory_space<vmem>>, %arg6: memref<1x4x64x128xf32, #tpu.memory_space<vmem>>) attributes {dimension_semantics = [#tpu.dimension_semantics<parallel>], iteration_bounds = array<i64: 2>, scalar_prefetch = 0 : i64, scratch_operands = 0 : i64, tpu.core_type = #tpu.core_type<tc>, window_params = [{transform_indices = @transform_0, window_bounds = array<i64: 1, 96, 128>}, {pipeline_mode = #tpu.pipeline_mode<synchronous>, transform_indices = @transform_1, window_bounds = array<i64: 4, 128, 128>}, {pipeline_mode = #tpu.pipeline_mode<synchronous>, transform_indices = @transform_2, window_bounds = array<i64: 4, 128, 256>}, {pipeline_mode = #tpu.pipeline_mode<synchronous>, transform_indices = @transform_3, window_bounds = array<i64: 128, 512>}, {pipeline_mode = #tpu.pipeline_mode<synchronous>, transform_indices = @transform_4, window_bounds = array<i64: 1, 128>}, {transform_indices = @transform_5, window_bounds = array<i64: 1, 4, 64, 128>}]} {
    %c0 = arith.constant 0 : index
    %c8 = arith.constant 8 : index
    %c0_0 = arith.constant 0 : index
    %0 = vector.load %arg1[%c0, %c8, %c0_0] : memref<1x96x128xf32, #tpu.memory_space<vmem>>, vector<1x80x128xf32>
    %1 = vector.shape_cast %0 : vector<1x80x128xf32> to vector<80x128xf32>
    %c0_1 = arith.constant 0 : index
    %c7 = arith.constant 7 : index
    %c0_2 = arith.constant 0 : index
    %2 = vector.load %arg1[%c0_1, %c7, %c0_2] : memref<1x96x128xf32, #tpu.memory_space<vmem>>, vector<1x80x128xf32>
    %3 = vector.shape_cast %2 : vector<1x80x128xf32> to vector<80x128xf32>
    %c0_3 = arith.constant 0 : index
    %c9 = arith.constant 9 : index
    %c0_4 = arith.constant 0 : index
    %4 = vector.load %arg1[%c0_3, %c9, %c0_4] : memref<1x96x128xf32, #tpu.memory_space<vmem>>, vector<1x80x128xf32>
    %5 = vector.shape_cast %4 : vector<1x80x128xf32> to vector<80x128xf32>
    %6 = tpu.iota {dimensions = array<i32: 0>} : vector<80x1xi32>
    %c8_i32 = arith.constant 8 : i32
    %c0_i32 = arith.constant 0 : i32
    %7 = arith.cmpi eq, %c8_i32, %c0_i32 : i32
    %c1_i32 = arith.constant 1 : i32
    %8 = arith.select %7, %c1_i32, %c8_i32 : i32
    %9 = vector.broadcast %8 : i32 to vector<80x1xi32>
    %10 = arith.remsi %6, %9 : vector<80x1xi32>
    %c0_i32_5 = arith.constant 0 : i32
    %11 = vector.broadcast %c0_i32_5 : i32 to vector<80x1xi32>
    %12 = arith.cmpi ne, %10, %11 : vector<80x1xi32>
    %c0_i32_6 = arith.constant 0 : i32
    %13 = vector.broadcast %c0_i32_6 : i32 to vector<80x1xi32>
    %14 = arith.cmpi slt, %10, %13 : vector<80x1xi32>
    %c0_i32_7 = arith.constant 0 : i32
    %15 = arith.cmpi slt, %8, %c0_i32_7 : i32
    %16 = vector.broadcast %15 : i1 to vector<80x1xi1>
    %17 = vector.broadcast %16 : vector<80x1xi1> to vector<80x1xi1>
    %18 = arith.xori %14, %17 : vector<80x1xi1>
    %19 = arith.andi %18, %12 : vector<80x1xi1>
    %20 = vector.broadcast %8 : i32 to vector<80x1xi32>
    %21 = arith.addi %10, %20 : vector<80x1xi32>
    %22 = arith.select %19, %21, %10 : vector<80x1xi1>, vector<80x1xi32>
    %c0_i32_8 = arith.constant 0 : i32
    %23 = vector.broadcast %c0_i32_8 : i32 to vector<80x1xi32>
    %24 = arith.cmpi eq, %22, %23 : vector<80x1xi32>
    %cst = arith.constant 0.000000e+00 : f32
    %25 = vector.shape_cast %24 : vector<80x1xi1> to vector<80x1xi1>
    %26 = vector.broadcast %25 : vector<80x1xi1> to vector<80x128xi1>
    %27 = vector.broadcast %cst : f32 to vector<80x128xf32>
    %28 = arith.select %26, %27, %3 : vector<80x128xi1>, vector<80x128xf32>
    %c7_i32 = arith.constant 7 : i32
    %29 = vector.broadcast %c7_i32 : i32 to vector<80x1xi32>
    %30 = arith.cmpi eq, %22, %29 : vector<80x1xi32>
    %cst_9 = arith.constant 0.000000e+00 : f32
    %31 = vector.shape_cast %30 : vector<80x1xi1> to vector<80x1xi1>
    %32 = vector.broadcast %31 : vector<80x1xi1> to vector<80x128xi1>
    %33 = vector.broadcast %cst_9 : f32 to vector<80x128xf32>
    %34 = arith.select %32, %33, %5 : vector<80x128xi1>, vector<80x128xf32>
    %35 = arith.truncf %28 : vector<80x128xf32> to vector<80x128xbf16>
    %36 = arith.truncf %1 : vector<80x128xf32> to vector<80x128xbf16>
    %37 = arith.truncf %34 : vector<80x128xf32> to vector<80x128xbf16>
    %38 = vector.extract_strided_slice %36 {offsets = [8, 0], sizes = [64, 128], strides = [1, 1]} : vector<80x128xbf16> to vector<64x128xbf16>
    %c0_10 = arith.constant 0 : index
    %c0_11 = arith.constant 0 : index
    %39 = vector.load %arg4[%c0_10, %c0_11] : memref<128x512xbf16, #tpu.memory_space<vmem>>, vector<128x512xbf16>
    %cst_12 = arith.constant dense<0.000000e+00> : vector<64x512xf32>
    %40 = tpu.matmul %38, %39, %cst_12 {dimension_numbers = #tpu.dot_dimension_numbers<[1], [0], [0], [1], [0, 0, 1, 1], [], []>} : vector<64x128xbf16>, vector<128x512xbf16>, vector<64x512xf32> -> vector<64x512xf32>
    %41 = vector.extract_strided_slice %40 {offsets = [0, 0], sizes = [64, 128], strides = [1, 1]} : vector<64x512xf32> to vector<64x128xf32>
    %42 = vector.extract_strided_slice %40 {offsets = [0, 128], sizes = [64, 128], strides = [1, 1]} : vector<64x512xf32> to vector<64x128xf32>
    %43 = vector.extract_strided_slice %40 {offsets = [0, 256], sizes = [64, 128], strides = [1, 1]} : vector<64x512xf32> to vector<64x128xf32>
    %44 = vector.extract_strided_slice %40 {offsets = [0, 384], sizes = [64, 128], strides = [1, 1]} : vector<64x512xf32> to vector<64x128xf32>
    %45 = vector.extract_strided_slice %36 {offsets = [0, 0], sizes = [64, 128], strides = [1, 1]} : vector<80x128xbf16> to vector<64x128xbf16>
    %c0_13 = arith.constant 0 : index
    %c0_14 = arith.constant 0 : index
    %c0_15 = arith.constant 0 : index
    %46 = vector.load %arg3[%c0_13, %c0_14, %c0_15] : memref<4x128x256xbf16, #tpu.memory_space<vmem>>, vector<1x128x256xbf16>
    %47 = vector.shape_cast %46 : vector<1x128x256xbf16> to vector<128x256xbf16>
    %cst_16 = arith.constant dense<0.000000e+00> : vector<64x256xf32>
    %48 = tpu.matmul %45, %47, %cst_16 {dimension_numbers = #tpu.dot_dimension_numbers<[1], [0], [0], [1], [0, 0, 1, 1], [], []>} : vector<64x128xbf16>, vector<128x256xbf16>, vector<64x256xf32> -> vector<64x256xf32>
    %49 = vector.extract_strided_slice %48 {offsets = [0, 0], sizes = [64, 128], strides = [1, 1]} : vector<64x256xf32> to vector<64x128xf32>
    %50 = arith.addf %41, %49 : vector<64x128xf32>
    %51 = vector.extract_strided_slice %48 {offsets = [0, 128], sizes = [64, 128], strides = [1, 1]} : vector<64x256xf32> to vector<64x128xf32>
    %52 = arith.addf %42, %51 : vector<64x128xf32>
    %53 = vector.extract_strided_slice %36 {offsets = [16, 0], sizes = [64, 128], strides = [1, 1]} : vector<80x128xbf16> to vector<64x128xbf16>
    %c1 = arith.constant 1 : index
    %c0_17 = arith.constant 0 : index
    %c0_18 = arith.constant 0 : index
    %54 = vector.load %arg3[%c1, %c0_17, %c0_18] : memref<4x128x256xbf16, #tpu.memory_space<vmem>>, vector<1x128x256xbf16>
    %55 = vector.shape_cast %54 : vector<1x128x256xbf16> to vector<128x256xbf16>
    %cst_19 = arith.constant dense<0.000000e+00> : vector<64x256xf32>
    %56 = tpu.matmul %53, %55, %cst_19 {dimension_numbers = #tpu.dot_dimension_numbers<[1], [0], [0], [1], [0, 0, 1, 1], [], []>} : vector<64x128xbf16>, vector<128x256xbf16>, vector<64x256xf32> -> vector<64x256xf32>
    %57 = vector.extract_strided_slice %56 {offsets = [0, 0], sizes = [64, 128], strides = [1, 1]} : vector<64x256xf32> to vector<64x128xf32>
    %58 = arith.addf %43, %57 : vector<64x128xf32>
    %59 = vector.extract_strided_slice %56 {offsets = [0, 128], sizes = [64, 128], strides = [1, 1]} : vector<64x256xf32> to vector<64x128xf32>
    %60 = arith.addf %44, %59 : vector<64x128xf32>
    %61 = vector.extract_strided_slice %35 {offsets = [8, 0], sizes = [64, 128], strides = [1, 1]} : vector<80x128xbf16> to vector<64x128xbf16>
    %c2 = arith.constant 2 : index
    %c0_20 = arith.constant 0 : index
    %c0_21 = arith.constant 0 : index
    %62 = vector.load %arg3[%c2, %c0_20, %c0_21] : memref<4x128x256xbf16, #tpu.memory_space<vmem>>, vector<1x128x256xbf16>
    %63 = vector.shape_cast %62 : vector<1x128x256xbf16> to vector<128x256xbf16>
    %cst_22 = arith.constant dense<0.000000e+00> : vector<64x256xf32>
    %64 = tpu.matmul %61, %63, %cst_22 {dimension_numbers = #tpu.dot_dimension_numbers<[1], [0], [0], [1], [0, 0, 1, 1], [], []>} : vector<64x128xbf16>, vector<128x256xbf16>, vector<64x256xf32> -> vector<64x256xf32>
    %65 = vector.extract_strided_slice %64 {offsets = [0, 0], sizes = [64, 128], strides = [1, 1]} : vector<64x256xf32> to vector<64x128xf32>
    %66 = arith.addf %50, %65 : vector<64x128xf32>
    %67 = vector.extract_strided_slice %64 {offsets = [0, 128], sizes = [64, 128], strides = [1, 1]} : vector<64x256xf32> to vector<64x128xf32>
    %68 = arith.addf %58, %67 : vector<64x128xf32>
    %69 = vector.extract_strided_slice %37 {offsets = [8, 0], sizes = [64, 128], strides = [1, 1]} : vector<80x128xbf16> to vector<64x128xbf16>
    %c3 = arith.constant 3 : index
    %c0_23 = arith.constant 0 : index
    %c0_24 = arith.constant 0 : index
    %70 = vector.load %arg3[%c3, %c0_23, %c0_24] : memref<4x128x256xbf16, #tpu.memory_space<vmem>>, vector<1x128x256xbf16>
    %71 = vector.shape_cast %70 : vector<1x128x256xbf16> to vector<128x256xbf16>
    %cst_25 = arith.constant dense<0.000000e+00> : vector<64x256xf32>
    %72 = tpu.matmul %69, %71, %cst_25 {dimension_numbers = #tpu.dot_dimension_numbers<[1], [0], [0], [1], [0, 0, 1, 1], [], []>} : vector<64x128xbf16>, vector<128x256xbf16>, vector<64x256xf32> -> vector<64x256xf32>
    %73 = vector.extract_strided_slice %72 {offsets = [0, 0], sizes = [64, 128], strides = [1, 1]} : vector<64x256xf32> to vector<64x128xf32>
    %74 = arith.addf %52, %73 : vector<64x128xf32>
    %75 = vector.extract_strided_slice %72 {offsets = [0, 128], sizes = [64, 128], strides = [1, 1]} : vector<64x256xf32> to vector<64x128xf32>
    %76 = arith.addf %60, %75 : vector<64x128xf32>
    %77 = vector.extract_strided_slice %35 {offsets = [0, 0], sizes = [64, 128], strides = [1, 1]} : vector<80x128xbf16> to vector<64x128xbf16>
    %c0_26 = arith.constant 0 : index
    %c0_27 = arith.constant 0 : index
    %c0_28 = arith.constant 0 : index
    %78 = vector.load %arg2[%c0_26, %c0_27, %c0_28] : memref<4x128x128xbf16, #tpu.memory_space<vmem>>, vector<1x128x128xbf16>
    %79 = vector.shape_cast %78 : vector<1x128x128xbf16> to vector<128x128xbf16>
    %cst_29 = arith.constant dense<0.000000e+00> : vector<64x128xf32>
    %80 = tpu.matmul %77, %79, %cst_29 {dimension_numbers = #tpu.dot_dimension_numbers<[1], [0], [0], [1], [0, 0, 1, 1], [], []>} : vector<64x128xbf16>, vector<128x128xbf16>, vector<64x128xf32> -> vector<64x128xf32>
    %81 = arith.addf %66, %80 : vector<64x128xf32>
    %82 = vector.extract_strided_slice %37 {offsets = [0, 0], sizes = [64, 128], strides = [1, 1]} : vector<80x128xbf16> to vector<64x128xbf16>
    %c1_30 = arith.constant 1 : index
    %c0_31 = arith.constant 0 : index
    %c0_32 = arith.constant 0 : index
    %83 = vector.load %arg2[%c1_30, %c0_31, %c0_32] : memref<4x128x128xbf16, #tpu.memory_space<vmem>>, vector<1x128x128xbf16>
    %84 = vector.shape_cast %83 : vector<1x128x128xbf16> to vector<128x128xbf16>
    %cst_33 = arith.constant dense<0.000000e+00> : vector<64x128xf32>
    %85 = tpu.matmul %82, %84, %cst_33 {dimension_numbers = #tpu.dot_dimension_numbers<[1], [0], [0], [1], [0, 0, 1, 1], [], []>} : vector<64x128xbf16>, vector<128x128xbf16>, vector<64x128xf32> -> vector<64x128xf32>
    %86 = arith.addf %74, %85 : vector<64x128xf32>
    %87 = vector.extract_strided_slice %35 {offsets = [16, 0], sizes = [64, 128], strides = [1, 1]} : vector<80x128xbf16> to vector<64x128xbf16>
    %c2_34 = arith.constant 2 : index
    %c0_35 = arith.constant 0 : index
    %c0_36 = arith.constant 0 : index
    %88 = vector.load %arg2[%c2_34, %c0_35, %c0_36] : memref<4x128x128xbf16, #tpu.memory_space<vmem>>, vector<1x128x128xbf16>
    %89 = vector.shape_cast %88 : vector<1x128x128xbf16> to vector<128x128xbf16>
    %cst_37 = arith.constant dense<0.000000e+00> : vector<64x128xf32>
    %90 = tpu.matmul %87, %89, %cst_37 {dimension_numbers = #tpu.dot_dimension_numbers<[1], [0], [0], [1], [0, 0, 1, 1], [], []>} : vector<64x128xbf16>, vector<128x128xbf16>, vector<64x128xf32> -> vector<64x128xf32>
    %91 = arith.addf %68, %90 : vector<64x128xf32>
    %92 = vector.extract_strided_slice %37 {offsets = [16, 0], sizes = [64, 128], strides = [1, 1]} : vector<80x128xbf16> to vector<64x128xbf16>
    %c3_38 = arith.constant 3 : index
    %c0_39 = arith.constant 0 : index
    %c0_40 = arith.constant 0 : index
    %93 = vector.load %arg2[%c3_38, %c0_39, %c0_40] : memref<4x128x128xbf16, #tpu.memory_space<vmem>>, vector<1x128x128xbf16>
    %94 = vector.shape_cast %93 : vector<1x128x128xbf16> to vector<128x128xbf16>
    %cst_41 = arith.constant dense<0.000000e+00> : vector<64x128xf32>
    %95 = tpu.matmul %92, %94, %cst_41 {dimension_numbers = #tpu.dot_dimension_numbers<[1], [0], [0], [1], [0, 0, 1, 1], [], []>} : vector<64x128xbf16>, vector<128x128xbf16>, vector<64x128xf32> -> vector<64x128xf32>
    %96 = arith.addf %76, %95 : vector<64x128xf32>
    %c0_42 = arith.constant 0 : index
    %c0_43 = arith.constant 0 : index
    %97 = vector.load %arg5[%c0_42, %c0_43] : memref<1x128xf32, #tpu.memory_space<vmem>>, vector<1x128xf32>
    %98 = vector.broadcast %97 : vector<1x128xf32> to vector<64x128xf32>
    %99 = arith.addf %81, %98 : vector<64x128xf32>
    %c0_44 = arith.constant 0 : index
    %c0_45 = arith.constant 0 : index
    %c0_46 = arith.constant 0 : index
    %c0_47 = arith.constant 0 : index
    %100 = vector.load %arg6[%c0_44, %c0_45, %c0_46, %c0_47] : memref<1x4x64x128xf32, #tpu.memory_space<vmem>>, vector<1x1x64x128xf32>
    %101 = vector.shape_cast %100 : vector<1x1x64x128xf32> to vector<64x128xf32>
    %102 = vector.shape_cast %99 : vector<64x128xf32> to vector<1x1x64x128xf32>
    tpu.vector_store %arg6[%c0_44, %c0_45, %c0_46, %c0_47], %102 {strides = array<i32>} : memref<1x4x64x128xf32, #tpu.memory_space<vmem>>, vector<1x1x64x128xf32>,
    %103 = vector.broadcast %97 : vector<1x128xf32> to vector<64x128xf32>
    %104 = arith.addf %86, %103 : vector<64x128xf32>
    %c0_48 = arith.constant 0 : index
    %c1_49 = arith.constant 1 : index
    %c0_50 = arith.constant 0 : index
    %c0_51 = arith.constant 0 : index
    %105 = vector.load %arg6[%c0_48, %c1_49, %c0_50, %c0_51] : memref<1x4x64x128xf32, #tpu.memory_space<vmem>>, vector<1x1x64x128xf32>
    %106 = vector.shape_cast %105 : vector<1x1x64x128xf32> to vector<64x128xf32>
    %107 = vector.shape_cast %104 : vector<64x128xf32> to vector<1x1x64x128xf32>
    tpu.vector_store %arg6[%c0_48, %c1_49, %c0_50, %c0_51], %107 {strides = array<i32>} : memref<1x4x64x128xf32, #tpu.memory_space<vmem>>, vector<1x1x64x128xf32>,
    %108 = vector.broadcast %97 : vector<1x128xf32> to vector<64x128xf32>
    %109 = arith.addf %91, %108 : vector<64x128xf32>
    %c0_52 = arith.constant 0 : index
    %c2_53 = arith.constant 2 : index
    %c0_54 = arith.constant 0 : index
    %c0_55 = arith.constant 0 : index
    %110 = vector.load %arg6[%c0_52, %c2_53, %c0_54, %c0_55] : memref<1x4x64x128xf32, #tpu.memory_space<vmem>>, vector<1x1x64x128xf32>
    %111 = vector.shape_cast %110 : vector<1x1x64x128xf32> to vector<64x128xf32>
    %112 = vector.shape_cast %109 : vector<64x128xf32> to vector<1x1x64x128xf32>
    tpu.vector_store %arg6[%c0_52, %c2_53, %c0_54, %c0_55], %112 {strides = array<i32>} : memref<1x4x64x128xf32, #tpu.memory_space<vmem>>, vector<1x1x64x128xf32>,
    %113 = vector.broadcast %97 : vector<1x128xf32> to vector<64x128xf32>
    %114 = arith.addf %96, %113 : vector<64x128xf32>
    %c0_56 = arith.constant 0 : index
    %c3_57 = arith.constant 3 : index
    %c0_58 = arith.constant 0 : index
    %c0_59 = arith.constant 0 : index
    %115 = vector.load %arg6[%c0_56, %c3_57, %c0_58, %c0_59] : memref<1x4x64x128xf32, #tpu.memory_space<vmem>>, vector<1x1x64x128xf32>
    %116 = vector.shape_cast %115 : vector<1x1x64x128xf32> to vector<64x128xf32>
    %117 = vector.shape_cast %114 : vector<64x128xf32> to vector<1x1x64x128xf32>
    tpu.vector_store %arg6[%c0_56, %c3_57, %c0_58, %c0_59], %117 {strides = array<i32>} : memref<1x4x64x128xf32, #tpu.memory_space<vmem>>, vector<1x1x64x128xf32>,
    return
  }
  func.func @transform_0(%arg0: i32) -> (i32, i32, i32) {
    %c0_i32 = arith.constant 0 : i32
    %c0_i32_0 = arith.constant 0 : i32
    %c0_i32_1 = arith.constant 0 : i32
    return %arg0, %c0_i32, %c0_i32_0 : i32, i32, i32
  }
  func.func @transform_1(%arg0: i32) -> (i32, i32, i32) {
    %c0_i32 = arith.constant 0 : i32
    %c0_i32_0 = arith.constant 0 : i32
    %c0_i32_1 = arith.constant 0 : i32
    %c0_i32_2 = arith.constant 0 : i32
    return %c0_i32, %c0_i32_0, %c0_i32_1 : i32, i32, i32
  }
  func.func @transform_2(%arg0: i32) -> (i32, i32, i32) {
    %c0_i32 = arith.constant 0 : i32
    %c0_i32_0 = arith.constant 0 : i32
    %c0_i32_1 = arith.constant 0 : i32
    %c0_i32_2 = arith.constant 0 : i32
    return %c0_i32, %c0_i32_0, %c0_i32_1 : i32, i32, i32
  }
  func.func @transform_3(%arg0: i32) -> (i32, i32) {
    %c0_i32 = arith.constant 0 : i32
    %c0_i32_0 = arith.constant 0 : i32
    %c0_i32_1 = arith.constant 0 : i32
    return %c0_i32, %c0_i32_0 : i32, i32
  }
  func.func @transform_4(%arg0: i32) -> (i32, i32) {
    %c0_i32 = arith.constant 0 : i32
    %c0_i32_0 = arith.constant 0 : i32
    %c0_i32_1 = arith.constant 0 : i32
    return %c0_i32, %c0_i32_0 : i32, i32
  }
  func.func @transform_5(%arg0: i32) -> (i32, i32, i32, i32) {
    %c0_i32 = arith.constant 0 : i32
    %c0_i32_0 = arith.constant 0 : i32
    %c0_i32_1 = arith.constant 0 : i32
    %c0_i32_2 = arith.constant 0 : i32
    return %arg0, %c0_i32, %c0_i32_0, %c0_i32_1 : i32, i32, i32, i32
  }
}

</mosaic_0001>

<bundles_post_ra>
// kernel: upsample_conv.1
= control target key start
LH: loop header
LB: loop body
LE: loop exit
PB: predicated region body
PF: predicated region fallthrough
CT: control target
= control target key end

     0   :  { %s2953_s18 = smov 0   ;;  %s4110_s0 = inlined_call_operand.vmem [shape: f32[2,96,128], index: 0, kind: input, shape index: {}]   ;;  %s4111_s1 = inlined_call_operand.vmem [shape: bf16[4,128,128], index: 1, kind: input, shape index: {}]   ;;  %s4112_s2 = inlined_call_operand.vmem [shape: bf16[4,128,256], index: 2, kind: input, shape index: {}]   ;;  %s4113_s3 = inlined_call_operand.vmem [shape: bf16[128,512], index: 3, kind: input, shape index: {}]   ;;  %s4114_s4 = inlined_call_operand.vmem [shape: f32[1,128], index: 4, kind: input, shape index: {}]   ;;  %s4115_s5 = inlined_call_operand.vmem [shape: f32[2,4,64,128], index: 5, kind: output, shape index: {}]  }
   0x1 LB: > { %s2134_s19 = sadd.s32 4294967295, %s2921_s18   ;;  %p2138_p0 = scmp.ge.s32.totalorder %s2921_s18, 1  ;;  %s2921_s18 = sphi %s2953_s18, %s15_s18  }
   0x2   : > { %p187_p1 = scmp.lt.s32.totalorder %s2921_s18, 3 }
   0x4   : > { %p188_p2 = pnand %p2138_p0, %p187_p1 }
   0x6   : > { %191 = sbr.rel (%p188_p2) target bundleno = 433 (0x1b1), region = 40 }
   0xb   : > { %v2256_v0 = vld [vmem:[%s4113_s3 + $0xe0] sm:$0xf]  ;;  %v2807_v1 = vld [vmem:[%s4113_s3 + $0xec] sm:$0xf0]  ;;  %v2805_v2 = vld [vmem:[%s4113_s3 + $0xe4] sm:$0xf] }
   0xc   : > { %v2257_v3 = vor.u32 %v2807_v1, %v2256_v0  ;;  %v2258_v4 = vld [vmem:[%s4113_s3 + $0xf0] sm:$0xf0]  ;;  %v2264_v5 = vld [vmem:[%s4113_s3 + $0xe8] sm:$0xf]  ;;  %v2808_v6 = vld [vmem:[%s4113_s3 + $0xf4] sm:$0xf0] }
   0xd   : > { %v2261_v7 = vor.u32 %v2805_v2, %v2258_v4  ;;  %v2265_v8 = vor.u32 %v2808_v6, %v2264_v5  ;;  %v2806_v9 = vld [vmem:[%s4113_s3 + $0xec] sm:$0xf]  ;;  %v2266_v10 = vld [vmem:[%s4113_s3 + $0xf8] sm:$0xf0]  ;;  %v2240_v11 = vld [vmem:[%s4113_s3 + $0xc0] sm:$0xf] }
   0xe   : > { %712 = vmatpush.bf16.msra.mxu0 %v2257_v3  ;;  %v2269_v12 = vor.u32 %v2806_v9, %v2266_v10  ;;  %v2803_v13 = vld [vmem:[%s4113_s3 + $0xcc] sm:$0xf0]  ;;  %v2801_v14 = vld [vmem:[%s4113_s3 + $0xc4] sm:$0xf]  ;;  %v2242_v15 = vld [vmem:[%s4113_s3 + $0xd0] sm:$0xf0] }
   0xf   : > { %741 = vmatpush.bf16.msra.mxu1 %v2261_v7  ;;  %770 = vmatpush.bf16.msra.mxu2 %v2265_v8  ;;  %v2241_v16 = vor.u32 %v2803_v13, %v2240_v11  ;;  %v2245_v17 = vor.u32 %v2801_v14, %v2242_v15  ;;  %v2248_v18 = vld [vmem:[%s4113_s3 + $0xc8] sm:$0xf]  ;;  %v2804_v19 = vld [vmem:[%s4113_s3 + $0xd4] sm:$0xf0]  ;;  %v2802_v20 = vld [vmem:[%s4113_s3 + $0xcc] sm:$0xf] }
  0x10   : > { %799 = vmatpush.bf16.msra.mxu3 %v2269_v12  ;;  %v2249_v21 = vor.u32 %v2804_v19, %v2248_v18  ;;  %v2250_v22 = vld [vmem:[%s4113_s3 + $0xd8] sm:$0xf0]  ;;  %v2224_v23 = vld [vmem:[%s4113_s3 + $0xa0] sm:$0xf]  ;;  %v2799_v24 = vld [vmem:[%s4113_s3 + $0xac] sm:$0xf0] }
  0x11   : > { %v2253_v25 = vor.u32 %v2802_v20, %v2250_v22  ;;  %v2797_v26 = vld [vmem:[%s4113_s3 + $0xa4] sm:$0xf]  ;;  %v2226_v27 = vld [vmem:[%s4113_s3 + $0xb0] sm:$0xf0]  ;;  %v2232_v28 = vld [vmem:[%s4113_s3 + $0xa8] sm:$0xf]  ;;  %v2225_v29 = vor.u32 %v2799_v24, %v2224_v23 }
  0x12   : > { %713 = vmatpush.bf16.msra.mxu0 %v2241_v16  ;;  %v2800_v30 = vld [vmem:[%s4113_s3 + $0xb4] sm:$0xf0]  ;;  %v2798_v31 = vld [vmem:[%s4113_s3 + $0xac] sm:$0xf]  ;;  %v2234_v32 = vld [vmem:[%s4113_s3 + $0xb8] sm:$0xf0]  ;;  %v2229_v33 = vor.u32 %v2797_v26, %v2226_v27 }
  0x13   : > { %742 = vmatpush.bf16.msra.mxu1 %v2245_v17  ;;  %771 = vmatpush.bf16.msra.mxu2 %v2249_v21  ;;  %v2233_v34 = vor.u32 %v2800_v30, %v2232_v28  ;;  %v2208_v35 = vld [vmem:[%s4113_s3 + $0x80] sm:$0xf]  ;;  %v2795_v36 = vld [vmem:[%s4113_s3 + $0x8c] sm:$0xf0]  ;;  %v2793_v37 = vld [vmem:[%s4113_s3 + $0x84] sm:$0xf]  ;;  %v2237_v38 = vor.u32 %v2798_v31, %v2234_v32 }
  0x14   : > { %800 = vmatpush.bf16.msra.mxu3 %v2253_v25  ;;  %v2210_v39 = vld [vmem:[%s4113_s3 + $0x90] sm:$0xf0]  ;;  %v2216_v40 = vld [vmem:[%s4113_s3 + $0x88] sm:$0xf]  ;;  %v2796_v41 = vld [vmem:[%s4113_s3 + $0x94] sm:$0xf0]  ;;  %v2209_v44 = vor.u32 %v2795_v36, %v2208_v35 }
  0x15   : > { %v2794_v42 = vld [vmem:[%s4113_s3 + $0x8c] sm:$0xf]  ;;  %v2218_v43 = vld [vmem:[%s4113_s3 + $0x98] sm:$0xf0]  ;;  %v2213_v45 = vor.u32 %v2793_v37, %v2210_v39  ;;  %v2217_v46 = vor.u32 %v2796_v41, %v2216_v40  ;;  %v2192_v47 = vld [vmem:[%s4113_s3 + $0x60] sm:$0xf] }
  0x16   : > { %714 = vmatpush.bf16.msra.mxu0 %v2225_v29  ;;  %v2791_v48 = vld [vmem:[%s4113_s3 + $0x6c] sm:$0xf0]  ;;  %v2789_v49 = vld [vmem:[%s4113_s3 + $0x64] sm:$0xf]  ;;  %v2221_v50 = vor.u32 %v2794_v42, %v2218_v43  ;;  %v2194_v51 = vld [vmem:[%s4113_s3 + $0x70] sm:$0xf0] }
  0x17   : > { %743 = vmatpush.bf16.msra.mxu1 %v2229_v33  ;;  %772 = vmatpush.bf16.msra.mxu2 %v2233_v34  ;;  %v2200_v52 = vld [vmem:[%s4113_s3 + $0x68] sm:$0xf]  ;;  %v2792_v53 = vld [vmem:[%s4113_s3 + $0x74] sm:$0xf0]  ;;  %v2790_v54 = vld [vmem:[%s4113_s3 + $0x6c] sm:$0xf]  ;;  %v2193_v56 = vor.u32 %v2791_v48, %v2192_v47  ;;  %v2197_v57 = vor.u32 %v2789_v49, %v2194_v51 }
  0x18   : > { %801 = vmatpush.bf16.msra.mxu3 %v2237_v38  ;;  %v2202_v55 = vld [vmem:[%s4113_s3 + $0x78] sm:$0xf0]  ;;  %v2201_v58 = vor.u32 %v2792_v53, %v2200_v52  ;;  %v2176_v59 = vld [vmem:[%s4113_s3 + $0x40] sm:$0xf]  ;;  %v2787_v60 = vld [vmem:[%s4113_s3 + $0x4c] sm:$0xf0] }
  0x19   : > { %v2785_v61 = vld [vmem:[%s4113_s3 + $0x44] sm:$0xf]  ;;  %v2205_v62 = vor.u32 %v2790_v54, %v2202_v55  ;;  %v2178_v63 = vld [vmem:[%s4113_s3 + $0x50] sm:$0xf0]  ;;  %v2184_v0 = vld [vmem:[%s4113_s3 + $0x48] sm:$0xf]  ;;  %v2177_v4 = vor.u32 %v2787_v60, %v2176_v59 }
  0x1a   : > { %715 = vmatpush.bf16.msra.mxu0 %v2209_v44  ;;  %v2788_v1 = vld [vmem:[%s4113_s3 + $0x54] sm:$0xf0]  ;;  %v2786_v2 = vld [vmem:[%s4113_s3 + $0x4c] sm:$0xf]  ;;  %v2186_v3 = vld [vmem:[%s4113_s3 + $0x58] sm:$0xf0]  ;;  %v2181_v6 = vor.u32 %v2785_v61, %v2178_v63 }
  0x1b   : > { %744 = vmatpush.bf16.msra.mxu1 %v2213_v45  ;;  %773 = vmatpush.bf16.msra.mxu2 %v2217_v46  ;;  %v2160_v5 = vld [vmem:[%s4113_s3 + $0x20] sm:$0xf]  ;;  %v2185_v7 = vor.u32 %v2788_v1, %v2184_v0  ;;  %v2783_v8 = vld [vmem:[%s4113_s3 + $0x2c] sm:$0xf0]  ;;  %v2781_v9 = vld [vmem:[%s4113_s3 + $0x24] sm:$0xf]  ;;  %v2189_v11 = vor.u32 %v2786_v2, %v2186_v3 }
  0x1c   : > { %802 = vmatpush.bf16.msra.mxu3 %v2221_v50  ;;  %v2162_v10 = vld [vmem:[%s4113_s3 + $0x30] sm:$0xf0]  ;;  %v2168_v12 = vld [vmem:[%s4113_s3 + $0x28] sm:$0xf]  ;;  %v2784_v13 = vld [vmem:[%s4113_s3 + $0x34] sm:$0xf0]  ;;  %v2161_v17 = vor.u32 %v2783_v8, %v2160_v5 }
  0x1d   : > { %p215_p3 = scmp.lt.s32.totalorder %s2134_s19, 1  ;;  %v2782_v14 = vld [vmem:[%s4113_s3 + $0x2c] sm:$0xf]  ;;  %v2170_v15 = vld [vmem:[%s4113_s3 + $0x38] sm:$0xf0]  ;;  %v2165_v20 = vor.u32 %v2781_v9, %v2162_v10  ;;  %v2169_v21 = vor.u32 %v2784_v13, %v2168_v12 }
  0x1e   : > { %716 = vmatpush.bf16.msra.mxu0 %v2193_v56  ;;  %v2144_v16 = vld [vmem:[%s4113_s3] sm:$0xf]  ;;  %v2779_v18 = vld [vmem:[%s4113_s3 + $0xc] sm:$0xf0]  ;;  %v2777_v19 = vld [vmem:[%s4113_s3 + $0x4] sm:$0xf]  ;;  %v2173_v25 = vor.u32 %v2782_v14, %v2170_v15 }
  0x1f   : > { %745 = vmatpush.bf16.msra.mxu1 %v2197_v57  ;;  %774 = vmatpush.bf16.msra.mxu2 %v2201_v58  ;;  %s4121_s19 = smov (!%p215_p3, %s2134_s19), 1  ;;  %v2146_v22 = vld [vmem:[%s4113_s3 + $0x10] sm:$0xf0]  ;;  %v2152_v23 = vld [vmem:[%s4113_s3 + $0x8] sm:$0xf]  ;;  %v2145_v31 = vor.u32 %v2779_v18, %v2144_v16 }
  0x20   : > { %803 = vmatpush.bf16.msra.mxu3 %v2205_v62  ;;  %v2780_v24 = vld [vmem:[%s4113_s3 + $0x14] sm:$0xf0]  ;;  %v2778_v26 = vld [vmem:[%s4113_s3 + $0xc] sm:$0xf]  ;;  %v2154_v27 = vld [vmem:[%s4113_s3 + $0x18] sm:$0xf0]  ;;  %v2149_v35 = vor.u32 %v2777_v19, %v2146_v22 }
  0x21   : > { %s2905_s8 = smul.u32 96, %s4121_s19  ;;  %v2408_v28 = vld [vmem:[%s4112_s2 + $0xf0] sm:$0xf]  ;;  %v2840_v29 = vld [vmem:[%s4112_s2 + $0xf4] sm:$0xf0]  ;;  %v2153_v36 = vor.u32 %v2780_v24, %v2152_v23  ;;  %v2157_v39 = vor.u32 %v2778_v26, %v2154_v27 }
  0x22   : > { %717 = vmatpush.bf16.msra.mxu0 %v2177_v4  ;;  %v2839_v30 = vld [vmem:[%s4112_s2 + $0xf4] sm:$0xf]  ;;  %v2410_v32 = vld [vmem:[%s4112_s2 + $0xf8] sm:$0xf0]  ;;  %v2328_v33 = vld [vmem:[%s4112_s2 + $0x70] sm:$0xf]  ;;  %v2409_v42 = vor.u32 %v2840_v29, %v2408_v28 }
  0x23   : > { %746 = vmatpush.bf16.msra.mxu1 %v2181_v6  ;;  %775 = vmatpush.bf16.msra.mxu2 %v2185_v7  ;;  %s3172_s17 = scalar_lea.vmem %s4110_s0, %s2905_s8  ;;  %v2824_v34 = vld [vmem:[%s4112_s2 + $0x74] sm:$0xf0]  ;;  %v2823_v43 = vld [vmem:[%s4112_s2 + $0x74] sm:$0xf]  ;;  %v2330_v44 = vld [vmem:[%s4112_s2 + $0x78] sm:$0xf0]  ;;  %v2413_v45 = vor.u32 %v2839_v30, %v2410_v32 }
  0x24   : > { %804 = vmatpush.bf16.msra.mxu3 %v2189_v11  ;;  %v226_v37 = vld [vmem:[%s3172_s17 + $0x10] sm:$0xff]  ;;  %v227_v38 = vld [vmem:[%s3172_s17 + $0x18] sm:$0xff]  ;;  %v2329_v46 = vor.u32 %v2824_v34, %v2328_v33  ;;  %v2400_v47 = vld [vmem:[%s4112_s2 + $0xe0] sm:$0xf]  ;;  %v2333_v56 = vor.u32 %v2823_v43, %v2330_v44 }
  0x25   : > { %v477_v40 = vpack.c.bf16 %v226_v37, %v226_v37  ;;  %v478_v41 = vpack.c.bf16 %v227_v38, %v227_v38  ;;  %v2838_v48 = vld [vmem:[%s4112_s2 + $0xe4] sm:$0xf0]  ;;  %v2837_v49 = vld [vmem:[%s4112_s2 + $0xe4] sm:$0xf]  ;;  %v2402_v52 = vld [vmem:[%s4112_s2 + $0xe8] sm:$0xf0] }
  0x26   : > { %718 = vmatpush.bf16.msra.mxu0 %v2161_v17  ;;  %v2320_v53 = vld [vmem:[%s4112_s2 + $0x60] sm:$0xf]  ;;  %v2822_v54 = vld [vmem:[%s4112_s2 + $0x64] sm:$0xf0]  ;;  %v2401_v57 = vor.u32 %v2838_v48, %v2400_v47  ;;  %v2821_v58 = vld [vmem:[%s4112_s2 + $0x64] sm:$0xf]  ;;  %v2405_v61 = vor.u32 %v2837_v49, %v2402_v52 }
  0x27   : > { %747 = vmatpush.bf16.msra.mxu1 %v2165_v20  ;;  %776 = vmatpush.bf16.msra.mxu2 %v2169_v21  ;;  %v3200_v50 = vunpack.c.l.b16 %v477_v40  ;;  %v3202_v51 = vunpack.c.l.b16 %v478_v41  ;;  %v2322_v59 = vld [vmem:[%s4112_s2 + $0x68] sm:$0xf0]  ;;  %v2392_v60 = vld [vmem:[%s4112_s2 + $0xd0] sm:$0xf]  ;;  %v2321_v62 = vor.u32 %v2822_v54, %v2320_v53  ;;  %v2836_v63 = vld [vmem:[%s4112_s2 + $0xd4] sm:$0xf0] }
  0x28   : > { %805 = vmatpush.bf16.msra.mxu3 %v2173_v25  ;;  %v2835_v0 = vld [vmem:[%s4112_s2 + $0xd4] sm:$0xf]  ;;  %v2394_v1 = vld [vmem:[%s4112_s2 + $0xd8] sm:$0xf0]  ;;  %v2312_v2 = vld [vmem:[%s4112_s2 + $0x50] sm:$0xf]  ;;  %v2325_v6 = vor.u32 %v2821_v58, %v2322_v59  ;;  %v2393_v7 = vor.u32 %v2836_v63, %v2392_v60 }
  0x29   : > { %v544_v55 = vpack.c.b16 %v3202_v51, %v3200_v50  ;;  %v2820_v3 = vld [vmem:[%s4112_s2 + $0x54] sm:$0xf0]  ;;  %v228_v4 = vld [vmem:[%s3172_s17 + $0x20] sm:$0xff]  ;;  %v229_v5 = vld [vmem:[%s3172_s17 + $0x28] sm:$0xff]  ;;  %v2397_v10 = vor.u32 %v2835_v0, %v2394_v1 }
  0x2a   : > { %719 = vmatpush.bf16.msra.mxu0 %v2145_v31  ;;  %v2819_v8 = vld [vmem:[%s4112_s2 + $0x54] sm:$0xf]  ;;  %v2314_v9 = vld [vmem:[%s4112_s2 + $0x58] sm:$0xf0]  ;;  %v2313_v11 = vor.u32 %v2820_v3, %v2312_v2  ;;  %v2384_v12 = vld [vmem:[%s4112_s2 + $0xc0] sm:$0xf]  ;;  %v479_v15 = vpack.c.bf16 %v228_v4, %v228_v4  ;;  %v480_v16 = vpack.c.bf16 %v229_v5, %v229_v5 }
  0x2b   : > { %748 = vmatpush.bf16.msra.mxu1 %v2149_v35  ;;  %777 = vmatpush.bf16.msra.mxu2 %v2153_v36  ;;  %v2834_v13 = vld [vmem:[%s4112_s2 + $0xc4] sm:$0xf0]  ;;  %v2833_v14 = vld [vmem:[%s4112_s2 + $0xc4] sm:$0xf]  ;;  %v2386_v17 = vld [vmem:[%s4112_s2 + $0xc8] sm:$0xf0]  ;;  %v2317_v20 = vor.u32 %v2819_v8, %v2314_v9 }
  0x2c   : > { %806 = vmatpush.bf16.msra.mxu3 %v2157_v39  ;;  %v2304_v18 = vld [vmem:[%s4112_s2 + $0x40] sm:$0xf]  ;;  %v2818_v19 = vld [vmem:[%s4112_s2 + $0x44] sm:$0xf0]  ;;  %v2385_v21 = vor.u32 %v2834_v13, %v2384_v12  ;;  %v2817_v22 = vld [vmem:[%s4112_s2 + $0x44] sm:$0xf]  ;;  %v2389_v24 = vor.u32 %v2833_v14, %v2386_v17  ;;  %v3280_v29 = vunpack.c.l.b16 %v479_v15  ;;  %v3282_v30 = vunpack.c.l.b16 %v480_v16 }
  0x2d   : > { %720 = vmatmul.bf16.vlgmr.msra.gmra.mxu0 %v544_v55  ;;  %v2306_v23 = vld [vmem:[%s4112_s2 + $0x48] sm:$0xf0]  ;;  %v2305_v25 = vor.u32 %v2818_v19, %v2304_v18  ;;  %v2376_v26 = vld [vmem:[%s4112_s2 + $0xb0] sm:$0xf]  ;;  %v2832_v27 = vld [vmem:[%s4112_s2 + $0xb4] sm:$0xf0] }
  0x2e   : > { %934 = vmatpush.bf16.msrb.mxu0 %v2329_v46  ;;  %749 = vmatmul.bf16.vlgmr.msra.gmra.mxu1 %v544_v55  ;;  %v2831_v28 = vld [vmem:[%s4112_s2 + $0xb4] sm:$0xf]  ;;  %v2378_v31 = vld [vmem:[%s4112_s2 + $0xb8] sm:$0xf0]  ;;  %v2296_v32 = vld [vmem:[%s4112_s2 + $0x30] sm:$0xf]  ;;  %v2309_v34 = vor.u32 %v2817_v22, %v2306_v23  ;;  %v2377_v35 = vor.u32 %v2832_v27, %v2376_v26  ;;  %v545_v43 = vpack.c.b16 %v3282_v30, %v3280_v29 }
  0x2f   : > { %1109 = vmatpush.bf16.msrb.mxu2 %v2409_v42  ;;  %807 = vmatmul.bf16.vlgmr.msra.gmra.mxu3 %v544_v55  ;;  %v2816_v33 = vld [vmem:[%s4112_s2 + $0x34] sm:$0xf0]  ;;  %v2815_v36 = vld [vmem:[%s4112_s2 + $0x34] sm:$0xf]  ;;  %v2298_v37 = vld [vmem:[%s4112_s2 + $0x38] sm:$0xf0]  ;;  %v2381_v38 = vor.u32 %v2831_v28, %v2378_v31 }
  0x30   : > { %1138 = vmatpush.bf16.msrb.mxu3 %v2413_v45  ;;  %778 = vmatmul.bf16.vlgmr.msra.gmra.mxu2 %v544_v55  ;;  %v2297_v39 = vor.u32 %v2816_v33, %v2296_v32  ;;  %v2368_v40 = vld [vmem:[%s4112_s2 + $0xa0] sm:$0xf]  ;;  %v2830_v41 = vld [vmem:[%s4112_s2 + $0xa4] sm:$0xf0]  ;;  %v2829_v42 = vld [vmem:[%s4112_s2 + $0xa4] sm:$0xf]  ;;  %v2301_v47 = vor.u32 %v2815_v36, %v2298_v37 }
  0x31   : > { %963 = vmatpush.bf16.msrb.mxu1 %v2333_v56  ;;  %v2370_v44 = vld [vmem:[%s4112_s2 + $0xa8] sm:$0xf0]  ;;  %v2288_v45 = vld [vmem:[%s4112_s2 + $0x20] sm:$0xf]  ;;  %v2814_v46 = vld [vmem:[%s4112_s2 + $0x24] sm:$0xf0]  ;;  %v2369_v48 = vor.u32 %v2830_v41, %v2368_v40 }
  0x32   : > { %935 = vmatpush.bf16.msrb.mxu0 %v2321_v62  ;;  %v2373_v49 = vor.u32 %v2829_v42, %v2370_v44  ;;  %v2289_v52 = vor.u32 %v2814_v46, %v2288_v45  ;;  %v2813_v53 = vld [vmem:[%s4112_s2 + $0x24] sm:$0xf]  ;;  %v2290_v54 = vld [vmem:[%s4112_s2 + $0x28] sm:$0xf0]  ;;  %v230_v55 = vld [vmem:[%s3172_s17 + $0x30] sm:$0xff] }
  0x33   : > { %1110 = vmatpush.bf16.msrb.mxu2 %v2401_v57  ;;  %v231_v56 = vld [vmem:[%s3172_s17 + $0x38] sm:$0xff]  ;;  %v2360_v57 = vld [vmem:[%s4112_s2 + $0x90] sm:$0xf]  ;;  %v2827_v59 = vld [vmem:[%s4112_s2 + $0x94] sm:$0xf]  ;;  %v2293_v60 = vor.u32 %v2813_v53, %v2290_v54 }
  0x34   : > { %1139 = vmatpush.bf16.msrb.mxu3 %v2405_v61  ;;  %v2828_v58 = vld [vmem:[%s4112_s2 + $0x94] sm:$0xf0]  ;;  %v2362_v62 = vld [vmem:[%s4112_s2 + $0x98] sm:$0xf0]  ;;  %v2280_v63 = vld [vmem:[%s4112_s2 + $0x10] sm:$0xf] }
  0x35   : > { %964 = vmatpush.bf16.msrb.mxu1 %v2325_v6  ;;  %v2361_v61 = vor.u32 %v2828_v58, %v2360_v57  ;;  %v2812_v0 = vld [vmem:[%s4112_s2 + $0x14] sm:$0xf0]  ;;  %v2365_v1 = vor.u32 %v2827_v59, %v2362_v62  ;;  %v2811_v3 = vld [vmem:[%s4112_s2 + $0x14] sm:$0xf]  ;;  %v2282_v4 = vld [vmem:[%s4112_s2 + $0x18] sm:$0xf0]  ;;  %v481_v6 = vpack.c.bf16 %v230_v55, %v230_v55 }
  0x36   : > { %936 = vmatpush.bf16.msrb.mxu0 %v2313_v11  ;;  %v2281_v2 = vor.u32 %v2812_v0, %v2280_v63  ;;  %v2352_v5 = vld [vmem:[%s4112_s2 + $0x80] sm:$0xf]  ;;  %v2826_v8 = vld [vmem:[%s4112_s2 + $0x84] sm:$0xf0]  ;;  %v2825_v9 = vld [vmem:[%s4112_s2 + $0x84] sm:$0xf]  ;;  %v2285_v13 = vor.u32 %v2811_v3, %v2282_v4 }
  0x37   : > { %1111 = vmatpush.bf16.msrb.mxu2 %v2393_v7  ;;  %v482_v7 = vpack.c.bf16 %v231_v56, %v231_v56  ;;  %v2272_v11 = vld [vmem:[%s4112_s2] sm:$0xf]  ;;  %v2810_v12 = vld [vmem:[%s4112_s2 + $0x4] sm:$0xf0]  ;;  %v2353_v14 = vor.u32 %v2826_v8, %v2352_v5  ;;  %v2809_v17 = vld [vmem:[%s4112_s2 + $0x4] sm:$0xf]  ;;  %v3375_v19 = vunpack.c.l.b16 %v481_v6 }
  0x38   : > { %1140 = vmatpush.bf16.msrb.mxu3 %v2397_v10  ;;  %v2354_v10 = vld [vmem:[%s4112_s2 + $0x88] sm:$0xf0]  ;;  %v2273_v16 = vor.u32 %v2810_v12, %v2272_v11  ;;  %v232_v23 = vld [vmem:[%s3172_s17 + $0x40] sm:$0xff]  ;;  %v2872_v26 = vld [vmem:[%s4112_s2 + $0x1f4] sm:$0xf0] }
  0x39   : > { %965 = vmatpush.bf16.msrb.mxu1 %v2317_v20  ;;  %v2357_v15 = vor.u32 %v2825_v9, %v2354_v10  ;;  %v2274_v18 = vld [vmem:[%s4112_s2 + $0x8] sm:$0xf0]  ;;  %v3377_v20 = vunpack.c.l.b16 %v482_v7  ;;  %v2871_v27 = vld [vmem:[%s4112_s2 + $0x1f4] sm:$0xf]  ;;  %v2570_v31 = vld [vmem:[%s4112_s2 + $0x1f8] sm:$0xf0] }
  0x3a   : > { %937 = vmatpush.bf16.msrb.mxu0 %v2305_v25  ;;  %v2568_v25 = vld [vmem:[%s4112_s2 + $0x1f0] sm:$0xf]  ;;  %v2856_v33 = vld [vmem:[%s4112_s2 + $0x174] sm:$0xf0]  ;;  %v2855_v36 = vld [vmem:[%s4112_s2 + $0x174] sm:$0xf] }
  0x3b   : > { %1112 = vmatpush.bf16.msrb.mxu2 %v2385_v21  ;;  %v2277_v21 = vor.u32 %v2809_v17, %v2274_v18  ;;  %v546_v22 = vpack.c.b16 %v3377_v20, %v3375_v19  ;;  %v2569_v28 = vor.u32 %v2872_v26, %v2568_v25  ;;  %v2488_v32 = vld [vmem:[%s4112_s2 + $0x170] sm:$0xf]  ;;  %v2490_v37 = vld [vmem:[%s4112_s2 + $0x178] sm:$0xf0]  ;;  %v2870_v42 = vld [vmem:[%s4112_s2 + $0x1e4] sm:$0xf0] }
  0x3c   : > { %1141 = vmatpush.bf16.msrb.mxu3 %v2389_v24  ;;  %v233_v24 = vld [vmem:[%s3172_s17 + $0x48] sm:$0xff]  ;;  %v2493_v41 = vor.u32 %v2855_v36, %v2490_v37  ;;  %v2552_v59 = vld [vmem:[%s4112_s2 + $0x1d0] sm:$0xf]  ;;  %v2554_v63 = vld [vmem:[%s4112_s2 + $0x1d8] sm:$0xf0] }
  0x3d   : > { %966 = vmatpush.bf16.msrb.mxu1 %v2309_v34  ;;  %725 = vmatmul.bf16.gmra.mxu0 %v545_v43  ;;  %v2573_v34 = vor.u32 %v2871_v27, %v2570_v31  ;;  %v484_v40 = vpack.c.bf16 %v233_v24, %v233_v24  ;;  %v2562_v44 = vld [vmem:[%s4112_s2 + $0x1e8] sm:$0xf0]  ;;  %v2472_v0 = vld [vmem:[%s4112_s2 + $0x150] sm:$0xf]  ;;  %v2851_v4 = vld [vmem:[%s4112_s2 + $0x154] sm:$0xf]  ;;  %v847_v24 = vpack.c.b16 %v3280_v29, %v3202_v51 }
  0x3e   : > { %938 = vmatpush.bf16.msrb.mxu0 %v2297_v39  ;;  %754 = vmatmul.bf16.gmra.mxu1 %v545_v43  ;;  %v483_v39 = vpack.c.bf16 %v232_v23, %v232_v23  ;;  %v2482_v53 = vld [vmem:[%s4112_s2 + $0x168] sm:$0xf0]  ;;  %v2474_v5 = vld [vmem:[%s4112_s2 + $0x158] sm:$0xf0]  ;;  %v2544_v6 = vld [vmem:[%s4112_s2 + $0x1c0] sm:$0xf] }
  0x3f   : > { %1113 = vmatpush.bf16.msrb.mxu2 %v2377_v35  ;;  %812 = vmatmul.bf16.gmra.mxu3 %v545_v43  ;;  %v2489_v35 = vor.u32 %v2856_v33, %v2488_v32  ;;  %v3433_v56 = vunpack.c.l.b16 %v484_v40  ;;  %v225_v58 = vld [vmem:[%s3172_s17 + $0x8] sm:$0xff]  ;;  %v2477_v8 = vor.u32 %v2851_v4, %v2474_v5  ;;  %v2865_v10 = vld [vmem:[%s4112_s2 + $0x1c4] sm:$0xf]  ;;  %v2536_v25 = vld [vmem:[%s4112_s2 + $0x1b0] sm:$0xf] }
  0x40   : > { %1142 = vmatpush.bf16.msrb.mxu3 %v2381_v38  ;;  %783 = vmatmul.bf16.gmra.mxu2 %v545_v43  ;;  %v2560_v38 = vld [vmem:[%s4112_s2 + $0x1e0] sm:$0xf]  ;;  %v2869_v43 = vld [vmem:[%s4112_s2 + $0x1e4] sm:$0xf]  ;;  %v3431_v55 = vunpack.c.l.b16 %v483_v39  ;;  %v476_v7 = vpack.c.bf16 %v225_v58, %v225_v58  ;;  %v2866_v9 = vld [vmem:[%s4112_s2 + $0x1c4] sm:$0xf0] }
  0x41   : > { %967 = vmatpush.bf16.msrb.mxu1 %v2301_v47  ;;  %v2561_v45 = vor.u32 %v2870_v42, %v2560_v38  ;;  %v2565_v46 = vor.u32 %v2869_v43, %v2562_v44  ;;  %v2480_v47 = vld [vmem:[%s4112_s2 + $0x160] sm:$0xf]  ;;  %v2546_v11 = vld [vmem:[%s4112_s2 + $0x1c8] sm:$0xf0]  ;;  %v2545_v12 = vor.u32 %v2866_v9, %v2544_v6  ;;  %v2864_v26 = vld [vmem:[%s4112_s2 + $0x1b4] sm:$0xf0] }
  0x42   : > { %939 = vmatpush.bf16.msrb.mxu0 %v2289_v52  ;;  %v547_v57 = vpack.c.b16 %v3433_v56, %v3431_v55  ;;  %v2466_v18 = vld [vmem:[%s4112_s2 + $0x148] sm:$0xf0]  ;;  %v2863_v27 = vld [vmem:[%s4112_s2 + $0x1b4] sm:$0xf]  ;;  %v2538_v51 = vld [vmem:[%s4112_s2 + $0x1b8] sm:$0xf0] }
  0x43   : > { %1114 = vmatpush.bf16.msrb.mxu2 %v2369_v48  ;;  %v2854_v48 = vld [vmem:[%s4112_s2 + $0x164] sm:$0xf0]  ;;  %v2456_v29 = vld [vmem:[%s4112_s2 + $0x130] sm:$0xf]  ;;  %v2541_v31 = vor.u32 %v2863_v27, %v2538_v51  ;;  %v2847_v33 = vld [vmem:[%s4112_s2 + $0x134] sm:$0xf] }
  0x44   : > { %1143 = vmatpush.bf16.msrb.mxu3 %v2373_v49  ;;  %v2853_v49 = vld [vmem:[%s4112_s2 + $0x164] sm:$0xf]  ;;  %v2481_v52 = vor.u32 %v2854_v48, %v2480_v47  ;;  %v2862_v37 = vld [vmem:[%s4112_s2 + $0x1a4] sm:$0xf0]  ;;  %v2530_v39 = vld [vmem:[%s4112_s2 + $0x1a8] sm:$0xf0]  ;;  %v848_v48 = vpack.c.b16 %v3375_v19, %v3282_v30 }
  0x45   : > { %968 = vmatpush.bf16.msrb.mxu1 %v2293_v60  ;;  %v2485_v54 = vor.u32 %v2853_v49, %v2482_v53  ;;  %v2868_v60 = vld [vmem:[%s4112_s2 + $0x1d4] sm:$0xf0]  ;;  %v2861_v38 = vld [vmem:[%s4112_s2 + $0x1a4] sm:$0xf]  ;;  %v2448_v42 = vld [vmem:[%s4112_s2 + $0x120] sm:$0xf] }
  0x46   : > { %940 = vmatpush.bf16.msrb.mxu0 %v2281_v2  ;;  %v2553_v62 = vor.u32 %v2868_v60, %v2552_v59  ;;  %v2846_v43 = vld [vmem:[%s4112_s2 + $0x124] sm:$0xf0]  ;;  %v2845_v44 = vld [vmem:[%s4112_s2 + $0x124] sm:$0xf]  ;;  %v2520_v49 = vld [vmem:[%s4112_s2 + $0x190] sm:$0xf] }
  0x47   : > { %1115 = vmatpush.bf16.msrb.mxu2 %v2361_v61  ;;  %v2867_v61 = vld [vmem:[%s4112_s2 + $0x1d4] sm:$0xf]  ;;  %v2522_v30 = vld [vmem:[%s4112_s2 + $0x198] sm:$0xf0]  ;;  %v2440_v19 = vld [vmem:[%s4112_s2 + $0x110] sm:$0xf] }
  0x48   : > { %1144 = vmatpush.bf16.msrb.mxu3 %v2365_v1  ;;  %v2852_v1 = vld [vmem:[%s4112_s2 + $0x154] sm:$0xf0]  ;;  %v2557_v2 = vor.u32 %v2867_v61, %v2554_v63  ;;  %v2859_v53 = vld [vmem:[%s4112_s2 + $0x194] sm:$0xf]  ;;  %v2442_v61 = vld [vmem:[%s4112_s2 + $0x118] sm:$0xf0] }
  0x49   : > { %969 = vmatpush.bf16.msrb.mxu1 %v2285_v13  ;;  %v2473_v3 = vor.u32 %v2852_v1, %v2472_v0  ;;  %v2549_v13 = vor.u32 %v2865_v10, %v2546_v11  ;;  %v2525_v58 = vor.u32 %v2859_v53, %v2522_v30  ;;  %v2843_v60 = vld [vmem:[%s4112_s2 + $0x114] sm:$0xf]  ;;  %v2858_v0 = vld [vmem:[%s4112_s2 + $0x184] sm:$0xf0]  ;;  %v2857_v1 = vld [vmem:[%s4112_s2 + $0x184] sm:$0xf]  ;;  %v849_v10 = vpack.c.b16 %v3431_v55, %v3377_v20 }
  0x4a   : > { %941 = vmatpush.bf16.msrb.mxu0 %v2273_v16  ;;  %v2849_v16 = vld [vmem:[%s4112_s2 + $0x144] sm:$0xf]  ;;  %v2445_v63 = vor.u32 %v2843_v60, %v2442_v61  ;;  %v2432_v5 = vld [vmem:[%s4112_s2 + $0x100] sm:$0xf]  ;;  %v2842_v6 = vld [vmem:[%s4112_s2 + $0x104] sm:$0xf0] }
  0x4b   : > { %1116 = vmatpush.bf16.msrb.mxu2 %v2353_v14  ;;  %v2464_v14 = vld [vmem:[%s4112_s2 + $0x140] sm:$0xf]  ;;  %v2434_v9 = vld [vmem:[%s4112_s2 + $0x108] sm:$0xf0]  ;;  %v2880_v55 = vld [vmem:[%s4111_s1 + $0x38] sm:$0xff] }
  0x4c   : > { %1145 = vmatpush.bf16.msrb.mxu3 %v2357_v15  ;;  %v2850_v15 = vld [vmem:[%s4112_s2 + $0x144] sm:$0xf0]  ;;  %v2887_v51 = vld [vmem:[%s4111_s1 + $0x70] sm:$0xff]  ;;  %v2877_v60 = vld [vmem:[%s4111_s1 + $0x20] sm:$0xff] }
  0x4d   : > { %970 = vmatpush.bf16.msrb.mxu1 %v2277_v21  ;;  %730 = vmatmul.bf16.gmra.mxu0 %v546_v22  ;;  %v2465_v17 = vor.u32 %v2850_v15, %v2464_v14  ;;  %v2469_v21 = vor.u32 %v2849_v16, %v2466_v18  ;;  %v2904_v14 = vld [vmem:[%s4111_s1 + $0xf8] sm:$0xff]  ;;  %v234_v15 = vld [vmem:[%s3172_s17 + $0x50] sm:$0xff]  ;;  %v2885_v61 = vld [vmem:[%s4111_s1 + $0x60] sm:$0xff] }
  0x4e   : > { %759 = vmatmul.bf16.gmra.mxu1 %v546_v22  ;;  %1304 = vmatpush.bf16.msra.mxu0 %v2489_v35  ;;  %v2528_v35 = vld [vmem:[%s4112_s2 + $0x1a0] sm:$0xf]  ;;  %v485_v20 = vpack.c.bf16 %v234_v15, %v234_v15  ;;  %v2895_v18 = vld [vmem:[%s4111_s1 + $0xb0] sm:$0xff] }
  0x4f   : > { %817 = vmatmul.bf16.gmra.mxu3 %v546_v22  ;;  %1499 = vmatpush.bf16.msra.mxu2 %v2569_v28  ;;  %v2848_v28 = vld [vmem:[%s4112_s2 + $0x134] sm:$0xf0]  ;;  %v2529_v40 = vor.u32 %v2862_v37, %v2528_v35  ;;  %v2902_v35 = vld [vmem:[%s4111_s1 + $0xe8] sm:$0xff] }
  0x50   : > { %788 = vmatmul.bf16.gmra.mxu2 %v546_v22  ;;  %1528 = vmatpush.bf16.msra.mxu3 %v2573_v34  ;;  %v845_v22 = vunpack.c.l.b16 %v476_v7  ;;  %v2457_v32 = vor.u32 %v2848_v28, %v2456_v29  ;;  %v2458_v34 = vld [vmem:[%s4112_s2 + $0x138] sm:$0xf0]  ;;  %v2841_v7 = vld [vmem:[%s4112_s2 + $0x104] sm:$0xf]  ;;  %v236_v29 = vld [vmem:[%s3172_s17 + $0xf] sm:$0xff] }
  0x51   : > { %1333 = vmatpush.bf16.msra.mxu1 %v2493_v41  ;;  %v2461_v36 = vor.u32 %v2847_v33, %v2458_v34  ;;  %v2533_v41 = vor.u32 %v2861_v38, %v2530_v39  ;;  %v2437_v11 = vor.u32 %v2841_v7, %v2434_v9  ;;  %v237_v28 = vld [vmem:[%s3172_s17 + $0x17] sm:$0xff]  ;;  %v2894_v34 = vld [vmem:[%s4111_s1 + $0xa8] sm:$0xff] }
  0x52   : > { %1305 = vmatpush.bf16.msra.mxu0 %v2481_v52  ;;  %v846_v23 = vpack.c.b16 %v3200_v50, %v845_v22  ;;  %v2537_v50 = vor.u32 %v2864_v26, %v2536_v25  ;;  %v2860_v52 = vld [vmem:[%s4112_s2 + $0x194] sm:$0xf0] }
  0x53   : > { %1500 = vmatpush.bf16.msra.mxu2 %v2561_v45  ;;  %v2449_v45 = vor.u32 %v2846_v43, %v2448_v42  ;;  %v2878_v42 = vld [vmem:[%s4111_s1 + $0x28] sm:$0xff] }
  0x54   : > { %1529 = vmatpush.bf16.msra.mxu3 %v2565_v46  ;;  %v2450_v46 = vld [vmem:[%s4112_s2 + $0x128] sm:$0xf0] }
  0x55   : > { %1334 = vmatpush.bf16.msra.mxu1 %v2485_v54  ;;  %v2453_v47 = vor.u32 %v2845_v44, %v2450_v46  ;;  %v2521_v54 = vor.u32 %v2860_v52, %v2520_v49  ;;  %v2886_v43 = vld [vmem:[%s4111_s1 + $0x68] sm:$0xff]  ;;  %v2893_v44 = vld [vmem:[%s4111_s1 + $0xa0] sm:$0xff] }
  0x56   : > { %1306 = vmatpush.bf16.msra.mxu0 %v2473_v3 }
  0x57   : > { %1501 = vmatpush.bf16.msra.mxu2 %v2553_v62  ;;  %v2512_v62 = vld [vmem:[%s4112_s2 + $0x180] sm:$0xf] }
  0x58   : > { %1530 = vmatpush.bf16.msra.mxu3 %v2557_v2  ;;  %v2514_v2 = vld [vmem:[%s4112_s2 + $0x188] sm:$0xf0]  ;;  %v2513_v3 = vor.u32 %v2858_v0, %v2512_v62  ;;  %v238_v62 = vld [vmem:[%s3172_s17 + $0x1f] sm:$0xff] }
  0x59   : > { %1335 = vmatpush.bf16.msra.mxu1 %v2477_v8  ;;  %v2517_v4 = vor.u32 %v2857_v1, %v2514_v2  ;;  %v2433_v8 = vor.u32 %v2842_v6, %v2432_v5  ;;  %v248_v0 = vld [vmem:[%s3172_s17 + $0x21] sm:$0xff]  ;;  %v249_v1 = vld [vmem:[%s3172_s17 + $0x29] sm:$0xff]  ;;  %v2900_v5 = vld [vmem:[%s4111_s1 + $0xd8] sm:$0xff] }
  0x5a   : > { %1307 = vmatpush.bf16.msra.mxu0 %v2465_v17  ;;  %v2888_v17 = vld [vmem:[%s4111_s1 + $0x78] sm:$0xff] }
  0x5b   : > { %1502 = vmatpush.bf16.msra.mxu2 %v2545_v12  ;;  %v255_v12 = vlaneseq }
  0x5c   : > { %1531 = vmatpush.bf16.msra.mxu3 %v2549_v13  ;;  %v2896_v13 = vld [vmem:[%s4111_s1 + $0xb8] sm:$0xff] }
  0x5d   : > { %735 = vmatmul.bf16.gmra.mxu0 %v547_v57  ;;  %1336 = vmatpush.bf16.msra.mxu1 %v2469_v21  ;;  %v3596_v16 = vshrl.u32 %v255_v12, 7 }
  0x5e   : > { %764 = vmatmul.bf16.gmra.mxu1 %v547_v57  ;;  %1308 = vmatpush.bf16.msra.mxu0 %v2457_v32  ;;  %v247_v32 = vld [vmem:[%s3172_s17 + $0x19] sm:$0xff] }
  0x5f   : > { %822 = vmatmul.bf16.gmra.mxu3 %v547_v57  ;;  %1503 = vmatpush.bf16.msra.mxu2 %v2537_v50  ;;  %v257_v21 = vadd.s32 8, %v3596_v16  ;;  %v258_v22 = vadd.s32 16, %v3596_v16  ;;  %v2879_v50 = vld [vmem:[%s4111_s1 + $0x30] sm:$0xff]  ;;  %v260_v46 = vadd.s32 32, %v3596_v16 }
  0x60   : > { %793 = vmatmul.bf16.gmra.mxu2 %v547_v57  ;;  %1532 = vmatpush.bf16.msra.mxu3 %v2541_v31  ;;  %v2844_v57 = vld [vmem:[%s4112_s2 + $0x114] sm:$0xf0] }
  0x61   : > { %1337 = vmatpush.bf16.msra.mxu1 %v2461_v36  ;;  %v2441_v59 = vor.u32 %v2844_v57, %v2440_v19  ;;  %v277_v25 = vand.u32 7, %v257_v21  ;;  %v284_v26 = vand.u32 7, %v258_v22  ;;  %v246_v31 = vld [vmem:[%s3172_s17 + $0x11] sm:$0xff]  ;;  %v298_v30 = vand.u32 7, %v260_v46 }
  0x62   : > { %1309 = vmatpush.bf16.msra.mxu0 %v2449_v45  ;;  %v259_v45 = vadd.s32 24, %v3596_v16  ;;  %v262_v21 = vadd.s32 48, %v3596_v16  ;;  %v2899_v22 = vld [vmem:[%s4111_s1 + $0xd0] sm:$0xff] }
  0x63   : > { %1504 = vmatpush.bf16.msra.mxu2 %v2529_v40  ;;  %vm387_vm0 = vcmp.eq.s32.totalorder %v277_v25, 0  ;;  %vm388_vm1 = vcmp.eq.s32.totalorder %v284_v26, 0  ;;  %vm427_vm2 = vcmp.eq.s32.totalorder %v277_v25, 7  ;;  %vm428_vm3 = vcmp.eq.s32.totalorder %v284_v26, 7 }
  0x64   : > { %1533 = vmatpush.bf16.msra.mxu3 %v2533_v41  ;;  %v418_v33 = vsel %vm388_vm1, 0.0, %v237_v28  ;;  %v457_v36 = vsel %vm427_vm2, 0.0, %v246_v31  ;;  %v458_v37 = vsel %vm428_vm3, 0.0, %v247_v32  ;;  %vm390_vm5 = vcmp.eq.s32.totalorder %v298_v30, 0 }
  0x65   : > { %1338 = vmatpush.bf16.msra.mxu1 %v2453_v47  ;;  %v468_v39 = vpack.c.bf16 %v418_v33, %v418_v33  ;;  %v487_v40 = vpack.c.bf16 %v457_v36, %v457_v36  ;;  %v488_v41 = vpack.c.bf16 %v458_v37, %v458_v37  ;;  %v2901_v47 = vld [vmem:[%s4111_s1 + $0xe0] sm:$0xff]  ;;  %vm430_vm7 = vcmp.eq.s32.totalorder %v298_v30, 7  ;;  %v2875_v33 = vld [vmem:[%s4111_s1 + $0x10] sm:$0xff] }
  0x66   : > { %1310 = vmatpush.bf16.msra.mxu0 %v2441_v59  ;;  %v460_v7 = vsel %vm430_vm7, 0.0, %v249_v1  ;;  %v241_v36 = vld [vmem:[%s3172_s17 + $0x37] sm:$0xff]  ;;  %v264_v1 = vadd.s32 64, %v3596_v16 }
  0x67   : > { %1505 = vmatpush.bf16.msra.mxu2 %v2521_v54  ;;  %v3645_v49 = vunpack.c.l.b16 %v468_v39  ;;  %v3647_v52 = vunpack.c.l.b16 %v487_v40  ;;  %v3649_v53 = vunpack.c.l.b16 %v488_v41  ;;  %v291_v54 = vand.u32 7, %v259_v45  ;;  %v250_v37 = vld [vmem:[%s3172_s17 + $0x31] sm:$0xff]  ;;  %v2890_v41 = vld [vmem:[%s4111_s1 + $0x88] sm:$0xff] }
  0x68   : > { %1534 = vmatpush.bf16.msra.mxu3 %v2525_v58  ;;  %v490_v15 = vpack.c.bf16 %v460_v7, %v460_v7 }
  0x69   : > { %1339 = vmatpush.bf16.msra.mxu1 %v2445_v63  ;;  %v1411_v59 = vpack.c.b16 %v3649_v53, %v3647_v52  ;;  %v239_v63 = vld [vmem:[%s3172_s17 + $0x27] sm:$0xff]  ;;  %vm389_vm4 = vcmp.eq.s32.totalorder %v291_v54, 0  ;;  %vm429_vm6 = vcmp.eq.s32.totalorder %v291_v54, 7 }
  0x6a   : > { %1311 = vmatpush.bf16.msra.mxu0 %v2433_v8  ;;  %v419_v2 = vsel %vm389_vm4, 0.0, %v238_v62  ;;  %v459_v6 = vsel %vm429_vm6, 0.0, %v248_v0  ;;  %v3703_v26 = vunpack.c.l.b16 %v490_v15  ;;  %v2882_v62 = vld [vmem:[%s4111_s1 + $0x48] sm:$0xff]  ;;  %v263_v0 = vadd.s32 56, %v3596_v16 }
  0x6b   : > { %1506 = vmatpush.bf16.msra.mxu2 %v2513_v3  ;;  %v420_v3 = vsel %vm390_vm5, 0.0, %v239_v63  ;;  %v2889_v63 = vld [vmem:[%s4111_s1 + $0x80] sm:$0xff] }
  0x6c   : > { %1535 = vmatpush.bf16.msra.mxu3 %v2517_v4  ;;  %v2892_v4 = vld [vmem:[%s4111_s1 + $0x98] sm:$0xff]  ;;  %v319_v7 = vand.u32 7, %v263_v0 }
  0x6d   : > { %942 = vmatmul.bf16.vlgmr.msrb.gmra.mxu0 %v846_v23  ;;  %1340 = vmatpush.bf16.msra.mxu1 %v2437_v11  ;;  %v470_v11 = vpack.c.bf16 %v420_v3, %v420_v3 }
  0x6e   : > { %971 = vmatmul.bf16.vlgmr.msrb.gmra.mxu1 %v846_v23  ;;  %v2903_v23 = vld [vmem:[%s4111_s1 + $0xf0] sm:$0xff]  ;;  %1647 = vmatpush.bf16.msrb.mxu0 %v2880_v55  ;;  %v2884_v55 = vld [vmem:[%s4111_s1 + $0x58] sm:$0xff]  ;;  %vm393_vm12 = vcmp.eq.s32.totalorder %v319_v7, 0  ;;  %vm433_vm14 = vcmp.eq.s32.totalorder %v319_v7, 7  ;;  %v235_v7 = vld [vmem:[%s3172_s17 + $0x7] sm:$0xff] }
  0x6f   : > { %1146 = vmatmul.bf16.vlgmr.msrb.gmra.mxu3 %v847_v24 }
  0x70   : > { %1117 = vmatmul.bf16.vlgmr.msrb.gmra.mxu2 %v847_v24  ;;  %1971 = vmatpush.bf16.msrb.mxu3 %v2904_v14  ;;  %v489_v14 = vpack.c.bf16 %v459_v6, %v459_v6 }
  0x71   : > { %1865 = vmatpush.bf16.msrb.mxu2 %v2896_v13  ;;  %1759 = vmatpush.bf16.msrb.mxu1 %v2888_v17  ;;  %v2891_v17 = vld [vmem:[%s4111_s1 + $0x90] sm:$0xff] }
  0x72   : > { %1648 = vmatpush.bf16.msrb.mxu0 %v2879_v50  ;;  %v3701_v25 = vunpack.c.l.b16 %v489_v14  ;;  %v312_v50 = vand.u32 7, %v262_v21 }
  0x74   : > { %1972 = vmatpush.bf16.msrb.mxu3 %v2903_v23  ;;  %vm392_vm9 = vcmp.eq.s32.totalorder %v312_v50, 0  ;;  %vm432_vm11 = vcmp.eq.s32.totalorder %v312_v50, 7  ;;  %v252_v50 = vld [vmem:[%s3172_s17 + $0x41] sm:$0xff] }
  0x75   : > { %1866 = vmatpush.bf16.msrb.mxu2 %v2895_v18  ;;  %1760 = vmatpush.bf16.msrb.mxu1 %v2887_v51  ;;  %v261_v18 = vadd.s32 40, %v3596_v16  ;;  %v422_v40 = vsel %vm392_vm9, 0.0, %v241_v36 }
  0x76   : > { %1649 = vmatpush.bf16.msrb.mxu0 %v2878_v42  ;;  %v2898_v42 = vld [vmem:[%s4111_s1 + $0xc8] sm:$0xff]  ;;  %v472_v54 = vpack.c.bf16 %v422_v40, %v422_v40 }
  0x78   : > { %1973 = vmatpush.bf16.msrb.mxu3 %v2902_v35  ;;  %v240_v35 = vld [vmem:[%s3172_s17 + $0x2f] sm:$0xff] }
  0x79   : > { %1867 = vmatpush.bf16.msrb.mxu2 %v2894_v34  ;;  %1761 = vmatpush.bf16.msrb.mxu1 %v2886_v43  ;;  %v2883_v34 = vld [vmem:[%s4111_s1 + $0x50] sm:$0xff] }
  0x7a   : > { %1650 = vmatpush.bf16.msrb.mxu0 %v2877_v60 }
  0x7c   : > { %1974 = vmatpush.bf16.msrb.mxu3 %v2901_v47 }
  0x7d   : > { %947 = vmatmul.bf16.gmra.mxu0 %v847_v24  ;;  %1868 = vmatpush.bf16.msrb.mxu2 %v2893_v44 }
  0x7e   : > { %976 = vmatmul.bf16.gmra.mxu1 %v847_v24  ;;  %v1026_v24 = vunpack.c.l.b16 %v485_v20  ;;  %v2876_v20 = vld [vmem:[%s4111_s1 + $0x18] sm:$0xff] }
  0x7f   : > { %1151 = vmatmul.bf16.gmra.mxu3 %v848_v48  ;;  %1762 = vmatpush.bf16.msrb.mxu1 %v2885_v61  ;;  %v2874_v61 = vld [vmem:[%s4111_s1 + $0x8] sm:$0xff] }
  0x80   : > { %1122 = vmatmul.bf16.gmra.mxu2 %v848_v48  ;;  %v1027_v27 = vpack.c.b16 %v1026_v24, %v3433_v56  ;;  %v417_v56 = vsel %vm387_vm0, 0.0, %v236_v29  ;;  %1975 = vmatpush.bf16.msrb.mxu3 %v2900_v5  ;;  %v3699_v24 = vunpack.c.l.b16 %v470_v11 }
  0x81   : > { %v467_v38 = vpack.c.bf16 %v417_v56, %v417_v56  ;;  %1869 = vmatpush.bf16.msrb.mxu2 %v2892_v4  ;;  %1651 = vmatpush.bf16.msrb.mxu0 %v2876_v20  ;;  %v1412_v56 = vpack.c.b16 %v3703_v26, %v3701_v25  ;;  %v3757_v4 = vunpack.c.l.b16 %v472_v54  ;;  %v2873_v20 = vld [vmem:[%s4111_s1] sm:$0xff] }
  0x83   : > { %1763 = vmatpush.bf16.msrb.mxu1 %v2884_v55  ;;  %v2881_v55 = vld [vmem:[%s4111_s1 + $0x40] sm:$0xff] }
  0x84   : > { %1976 = vmatpush.bf16.msrb.mxu3 %v2899_v22  ;;  %v242_v22 = vld [vmem:[%s3172_s17 + $0x3f] sm:$0xff] }
  0x85   : > { %1870 = vmatpush.bf16.msrb.mxu2 %v2891_v17  ;;  %1652 = vmatpush.bf16.msrb.mxu0 %v2875_v33 }
  0x87   : > { %1764 = vmatpush.bf16.msrb.mxu1 %v2883_v34  ;;  %v463_v34 = vsel %vm433_vm14, 0.0, %v252_v50 }
  0x88   : > { %1977 = vmatpush.bf16.msrb.mxu3 %v2898_v42  ;;  %v493_v42 = vpack.c.bf16 %v463_v34, %v463_v34 }
  0x89   : > { %1871 = vmatpush.bf16.msrb.mxu2 %v2890_v41  ;;  %1653 = vmatpush.bf16.msrb.mxu0 %v2874_v61 }
  0x8a   : > { %v3797_v54 = vunpack.c.l.b16 %v493_v42 }
  0x8b   : > { %1765 = vmatpush.bf16.msrb.mxu1 %v2882_v62 }
  0x8d   : > { %952 = vmatmul.bf16.gmra.mxu0 %v848_v48  ;;  %1872 = vmatpush.bf16.msrb.mxu2 %v2889_v63 }
  0x8e   : > { %981 = vmatmul.bf16.gmra.mxu1 %v848_v48  ;;  %v3643_v48 = vunpack.c.l.b16 %v467_v38  ;;  %v251_v38 = vld [vmem:[%s3172_s17 + $0x39] sm:$0xff]  ;;  %1654 = vmatpush.bf16.msrb.mxu0 %v2873_v20 }
  0x8f   : > { %1156 = vmatmul.bf16.gmra.mxu3 %v849_v10  ;;  %v462_v44 = vsel %vm432_vm11, 0.0, %v251_v38  ;;  %1766 = vmatpush.bf16.msrb.mxu1 %v2881_v55 }
  0x90   : > { %1127 = vmatmul.bf16.gmra.mxu2 %v849_v10  ;;  %v1216_v19 = vpack.c.b16 %v3645_v49, %v3643_v48  ;;  %v492_v60 = vpack.c.bf16 %v462_v44, %v462_v44 }
  0x92   : > { %v3761_v6 = vunpack.c.l.b16 %v492_v60  ;;  %v270_v60 = vand.u32 7, %v3596_v16 }
  0x94   : > { %vm386_vm0 = vcmp.eq.s32.totalorder %v270_v60, 0  ;;  %vm426_vm1 = vcmp.eq.s32.totalorder %v270_v60, 7 }
  0x9d   : > { %957 = vmatmul.bf16.gmra.mxu0 %v849_v10 }
  0x9e   : > { %986 = vmatmul.bf16.gmra.mxu1 %v849_v10  ;;  %v469_v10 = vpack.c.bf16 %v419_v2, %v419_v2  ;;  %v2897_v2 = vld [vmem:[%s4111_s1 + $0xc0] sm:$0xff] }
  0x9f   : > { %1161 = vmatmul.bf16.gmra.mxu3 %v1027_v27 }
  0xa0   : > { %1132 = vmatmul.bf16.gmra.mxu2 %v1027_v27  ;;  %v3697_v23 = vunpack.c.l.b16 %v469_v10  ;;  %v305_v27 = vand.u32 7, %v261_v18  ;;  %1978 = vmatpush.bf16.msrb.mxu3 %v2897_v2  ;;  %v326_v10 = vand.u32 7, %v264_v1 }
  0xa2   : > { %v1217_v28 = vpack.c.b16 %v3699_v24, %v3697_v23  ;;  %vm391_vm8 = vcmp.eq.s32.totalorder %v305_v27, 0  ;;  %vm431_vm10 = vcmp.eq.s32.totalorder %v305_v27, 7  ;;  %v243_v27 = vld [vmem:[%s3172_s17 + $0x47] sm:$0xff]  ;;  %vm394_vm13 = vcmp.eq.s32.totalorder %v326_v10, 0 }
  0xa3   : > { %v421_v39 = vsel %vm391_vm8, 0.0, %v240_v35  ;;  %v461_v43 = vsel %vm431_vm10, 0.0, %v250_v37  ;;  %vm434_vm15 = vcmp.eq.s32.totalorder %v326_v10, 7  ;;  %v424_v33 = vsel %vm394_vm13, 0.0, %v243_v27  ;;  %v245_v10 = vld [vmem:[%s3172_s17 + $0x9] sm:$0xff] }
  0xa4   : > { %v471_v47 = vpack.c.bf16 %v421_v39, %v421_v39  ;;  %v474_v39 = vpack.c.bf16 %v424_v33, %v424_v33  ;;  %v456_v20 = vsel %vm426_vm1, 0.0, %v245_v10  ;;  %v1592_v42 = vpack.c.b16 %v3697_v23, %v3645_v49 }
  0xa6   : > { %v3755_v3 = vunpack.c.l.b16 %v471_v47  ;;  %v3795_v47 = vunpack.c.l.b16 %v474_v39 }
  0xa8   : > { %v1218_v15 = vpack.c.b16 %v3757_v4, %v3755_v3 }
  0xaa   : > { %v3653_v57 = vpop.f32.mrf.mxu0 }
  0xab   : > { %v3655_v58 = vpop.f32.mrf.mxu1 }
  0xad   : > { %1312 = vmatmul.bf16.vlgmr.msra.gmra.mxu0 %v1216_v19 }
  0xae   : > { %1341 = vmatmul.bf16.vlgmr.msra.gmra.mxu1 %v1216_v19 }
  0xaf   : > { %1536 = vmatmul.bf16.vlgmr.msra.gmra.mxu3 %v1411_v59 }
  0xb0   : > { %1507 = vmatmul.bf16.vlgmr.msra.gmra.mxu2 %v1411_v59  ;;  %v491_v59 = vpack.c.bf16 %v461_v43, %v461_v43 }
  0xb2   : > { %v3677_v9 = vpop.f32.mrf.mxu3  ;;  %v3679_v12 = vpop.f32.mrf.mxu0  ;;  %v3759_v5 = vunpack.c.l.b16 %v491_v59 }
  0xb3   : > { %v3675_v8 = vpop.f32.mrf.mxu2  ;;  %v3681_v13 = vpop.f32.mrf.mxu1 }
  0xb4   : > { %v1413_v21 = vpack.c.b16 %v3761_v6, %v3759_v5 }
  0xba   : > { %v3707_v29 = vpop.f32.mrf.mxu3  ;;  %v3711_v31 = vpop.f32.mrf.mxu0 }
  0xbb   : > { %v3705_v51 = vpop.f32.mrf.mxu2  ;;  %v3713_v32 = vpop.f32.mrf.mxu1 }
  0xbd   : > { %1317 = vmatmul.bf16.gmra.mxu0 %v1217_v28 }
  0xbe   : > { %1346 = vmatmul.bf16.gmra.mxu1 %v1217_v28  ;;  %v253_v28 = vld [vmem:[%s3172_s17 + $0x49] sm:$0xff] }
  0xbf   : > { %1541 = vmatmul.bf16.gmra.mxu3 %v1412_v56  ;;  %v464_v35 = vsel %vm434_vm15, 0.0, %v253_v28 }
  0xc0   : > { %1512 = vmatmul.bf16.gmra.mxu2 %v1412_v56  ;;  %v423_v56 = vsel %vm393_vm12, 0.0, %v242_v22  ;;  %v494_v43 = vpack.c.bf16 %v464_v35, %v464_v35 }
  0xc1   : > { %v473_v38 = vpack.c.bf16 %v423_v56, %v423_v56 }
  0xc2   : > { %v3735_v46 = vpop.f32.mrf.mxu3  ;;  %v3737_v30 = vpop.f32.mrf.mxu0  ;;  %v3799_v59 = vunpack.c.l.b16 %v494_v43  ;;  %v1704_v43 = vpack.c.b16 %v3701_v25, %v3649_v53 }
  0xc3   : > { %v3733_v45 = vpop.f32.mrf.mxu2  ;;  %v3739_v19 = vpop.f32.mrf.mxu1  ;;  %v3793_v44 = vunpack.c.l.b16 %v473_v38 }
  0xc4   : > { %v1414_v2 = vpack.c.b16 %v3799_v59, %v3797_v54 }
  0xc5   : > { %v1219_v63 = vpack.c.b16 %v3795_v47, %v3793_v44 }
  0xca   : > { %v3765_v14 = vpop.f32.mrf.mxu3  ;;  %v3775_v17 = vpop.f32.mrf.mxu0 }
  0xcb   : > { %v3763_v11 = vpop.f32.mrf.mxu2  ;;  %v3777_v18 = vpop.f32.mrf.mxu1 }
  0xcd   : > { %1322 = vmatmul.bf16.gmra.mxu0 %v1218_v15 }
  0xce   : > { %1351 = vmatmul.bf16.gmra.mxu1 %v1218_v15  ;;  %v416_v15 = vsel %vm386_vm0, 0.0, %v235_v7 }
  0xcf   : > { %1546 = vmatmul.bf16.gmra.mxu3 %v1413_v21  ;;  %v466_v55 = vpack.c.bf16 %v416_v15, %v416_v15 }
  0xd0   : > { %1517 = vmatmul.bf16.gmra.mxu2 %v1413_v21  ;;  %v486_v21 = vpack.c.bf16 %v456_v20, %v456_v20 }
  0xd1   : > { %v1590_v56 = vunpack.c.l.b16 %v466_v55 }
  0xd2   : > { %v3787_v37 = vpop.f32.mrf.mxu3  ;;  %v3789_v40 = vpop.f32.mrf.mxu0  ;;  %v1702_v33 = vunpack.c.l.b16 %v486_v21 }
  0xd3   : > { %v3785_v36 = vpop.f32.mrf.mxu2  ;;  %v3791_v41 = vpop.f32.mrf.mxu1  ;;  %v1591_v34 = vpack.c.b16 %v3643_v48, %v1590_v56 }
  0xd4   : > { %v1703_v35 = vpack.c.b16 %v3647_v52, %v1702_v33 }
  0xda   : > { %v3804_v62 = vpop.f32.mrf.mxu3  ;;  %v3808_v0 = vpop.f32.mrf.mxu0 }
  0xdb   : > { %v3802_v61 = vpop.f32.mrf.mxu2  ;;  %v3810_v1 = vpop.f32.mrf.mxu1 }
  0xdd   : > { %1327 = vmatmul.bf16.gmra.mxu0 %v1219_v63 }
  0xde   : > { %1356 = vmatmul.bf16.gmra.mxu1 %v1219_v63 }
  0xdf   : > { %1551 = vmatmul.bf16.gmra.mxu3 %v1414_v2 }
  0xe0   : > { %1522 = vmatmul.bf16.gmra.mxu2 %v1414_v2 }
  0xe2   : > { %v3818_v27 = vpop.f32.mrf.mxu3  ;;  %v3820_v50 = vpop.f32.mrf.mxu0 }
  0xe3   : > { %v3816_v22 = vpop.f32.mrf.mxu2  ;;  %v3822_v28 = vpop.f32.mrf.mxu1 }
  0xea   : > { %v3828_v39 = vpop.f32.mrf.mxu3  ;;  %v943_v60 = vpop.f32.mrf.mxu0 }
  0xeb   : > { %v3826_v38 = vpop.f32.mrf.mxu2  ;;  %v972_v63 = vpop.f32.mrf.mxu1  ;;  %v3835_v2 = vadd.f32 %v943_v60, %v3653_v57 }
  0xec   : > { %v3838_v7 = vadd.f32 %v972_v63, %v3655_v58 }
  0xed   : > { %1655 = vmatmul.bf16.vlgmr.msrb.gmra.mxu0 %v1591_v34 }
  0xee   : > { %1767 = vmatmul.bf16.vlgmr.msrb.gmra.mxu1 %v1703_v35 }
  0xef   : > { %1979 = vmatmul.bf16.vlgmr.msrb.gmra.mxu3 %v1704_v43 }
  0xf0   : > { %1873 = vmatmul.bf16.vlgmr.msrb.gmra.mxu2 %v1592_v42 }
  0xf2   : > { %v1147_v52 = vpop.f32.mrf.mxu3  ;;  %v945_v53 = vpop.f32.mrf.mxu0 }
  0xf3   : > { %v1118_v48 = vpop.f32.mrf.mxu2  ;;  %v3844_v49 = vadd.f32 %v1147_v52, %v3677_v9  ;;  %v974_v23 = vpop.f32.mrf.mxu1  ;;  %v3847_v57 = vadd.f32 %v945_v53, %v3679_v12  ;;  %v1593_v9 = vpack.c.b16 %v3755_v3, %v3699_v24  ;;  %v1705_v12 = vpack.c.b16 %v3759_v5, %v3703_v26 }
  0xf4   : > { %v3841_v10 = vadd.f32 %v1118_v48, %v3675_v8  ;;  %v3850_v58 = vadd.f32 %v974_v23, %v3681_v13  ;;  %v265_v5 = vadd.s32 72, %v3596_v16  ;;  %v244_v48 = vld [vmem:[%s3172_s17 + $0x4f] sm:$0xff] }
  0xf6   : > { %v333_v34 = vand.u32 7, %v265_v5 }
  0xf8   : > { %vm395_vm2 = vcmp.eq.s32.totalorder %v333_v34, 0  ;;  %vm435_vm3 = vcmp.eq.s32.totalorder %v333_v34, 7 }
  0xfa   : > { %v1149_v15 = vpop.f32.mrf.mxu3  ;;  %v948_v8 = vpop.f32.mrf.mxu0 }
  0xfb   : > { %v1120_v25 = vpop.f32.mrf.mxu2  ;;  %v3856_v55 = vadd.f32 %v1149_v15, %v3707_v29  ;;  %v977_v21 = vpop.f32.mrf.mxu1  ;;  %v3863_v56 = vadd.f32 %v948_v8, %v3711_v31 }
  0xfc   : > { %v3853_v20 = vadd.f32 %v1120_v25, %v3705_v51  ;;  %v3866_v13 = vadd.f32 %v977_v21, %v3713_v32 }
  0xfd   : > { %1660 = vmatmul.bf16.gmra.mxu0 %v1592_v42 }
  0xfe   : > { %1772 = vmatmul.bf16.gmra.mxu1 %v1704_v43 }
  0xff   : > { %1984 = vmatmul.bf16.gmra.mxu3 %v1705_v12 }
 0x100   : > { %1878 = vmatmul.bf16.gmra.mxu2 %v1593_v9 }
 0x102   : > { %v1152_v29 = vpop.f32.mrf.mxu3  ;;  %v950_v3 = vpop.f32.mrf.mxu0 }
 0x103   : > { %v1123_v51 = vpop.f32.mrf.mxu2  ;;  %v3872_v24 = vadd.f32 %v1152_v29, %v3735_v46  ;;  %v979_v26 = vpop.f32.mrf.mxu1  ;;  %v3875_v31 = vadd.f32 %v950_v3, %v3737_v30  ;;  %v1594_v30 = vpack.c.b16 %v3793_v44, %v3757_v4 }
 0x104   : > { %v3869_v33 = vadd.f32 %v1123_v51, %v3733_v45  ;;  %v3878_v32 = vadd.f32 %v979_v26, %v3739_v19  ;;  %v1706_v19 = vpack.c.b16 %v3797_v54, %v3761_v6 }
 0x10a   : > { %v1154_v42 = vpop.f32.mrf.mxu3  ;;  %v953_v43 = vpop.f32.mrf.mxu0 }
 0x10b   : > { %v1125_v35 = vpop.f32.mrf.mxu2  ;;  %v3885_v46 = vadd.f32 %v1154_v42, %v3765_v14  ;;  %v982_v60 = vpop.f32.mrf.mxu1  ;;  %v3892_v63 = vadd.f32 %v953_v43, %v3775_v17  ;;  %v425_v14 = vsel %vm395_vm2, 0.0, %v244_v48 }
 0x10c   : > { %v3882_v45 = vadd.f32 %v1125_v35, %v3763_v11  ;;  %v3895_v16 = vadd.f32 %v982_v60, %v3777_v18  ;;  %v254_v11 = vld [vmem:[%s3172_s17 + $0x51] sm:$0xff]  ;;  %v475_v53 = vpack.c.bf16 %v425_v14, %v425_v14  ;;  %s2776_s17 = sshll.u32 %s4121_s19, 8 }
 0x10d   : > { %1665 = vmatmul.bf16.gmra.mxu0 %v1593_v9  ;;  %v465_v52 = vsel %vm435_vm3, 0.0, %v254_v11  ;;  %s3996_s19 = scalar_lea.vmem %s4115_s5, %s2776_s17 }
 0x10e   : > { %1777 = vmatmul.bf16.gmra.mxu1 %v1705_v12  ;;  %v495_v23 = vpack.c.bf16 %v465_v52, %v465_v52  ;;  %v1814_v8 = vunpack.c.l.b16 %v475_v53 }
 0x10f   : > { %1989 = vmatmul.bf16.gmra.mxu3 %v1706_v19 }
 0x110   : > { %1883 = vmatmul.bf16.gmra.mxu2 %v1594_v30  ;;  %v1920_v21 = vunpack.c.l.b16 %v495_v23  ;;  %v1815_v3 = vpack.c.b16 %v1814_v8, %v3795_v47 }
 0x112   : > { %v1157_v44 = vpop.f32.mrf.mxu3  ;;  %v955_v54 = vpop.f32.mrf.mxu0  ;;  %v1921_v26 = vpack.c.b16 %v1920_v21, %v3799_v59 }
 0x113   : > { %v1128_v4 = vpop.f32.mrf.mxu2  ;;  %v3901_v17 = vadd.f32 %v1157_v44, %v3787_v37  ;;  %v984_v18 = vpop.f32.mrf.mxu1  ;;  %v3904_v25 = vadd.f32 %v955_v54, %v3789_v40 }
 0x114   : > { %v1171_v6 = vadd.f32 %v1128_v4, %v3785_v36  ;;  %v3907_v15 = vadd.f32 %v984_v18, %v3791_v41 }
 0x11a   : > { %v1159_v12 = vpop.f32.mrf.mxu3  ;;  %v958_v37 = vpop.f32.mrf.mxu0 }
 0x11b   : > { %v1130_v9 = vpop.f32.mrf.mxu2  ;;  %v3911_v36 = vadd.f32 %v1159_v12, %v3804_v62  ;;  %v987_v29 = vpop.f32.mrf.mxu1  ;;  %v3916_v40 = vadd.f32 %v958_v37, %v3808_v0 }
 0x11c   : > { %v1172_v51 = vadd.f32 %v1130_v9, %v3802_v61  ;;  %v3919_v41 = vadd.f32 %v987_v29, %v3810_v1 }
 0x11d   : > { %1670 = vmatmul.bf16.gmra.mxu0 %v1594_v30 }
 0x11e   : > { %1782 = vmatmul.bf16.gmra.mxu1 %v1706_v19 }
 0x11f   : > { %1994 = vmatmul.bf16.gmra.mxu3 %v1921_v26 }
 0x120   : > { %1888 = vmatmul.bf16.gmra.mxu2 %v1815_v3 }
 0x122   : > { %v1162_v5 = vpop.f32.mrf.mxu3  ;;  %v960_v47 = vpop.f32.mrf.mxu0 }
 0x123   : > { %v1133_v61 = vpop.f32.mrf.mxu2  ;;  %v3923_v34 = vadd.f32 %v1162_v5, %v3818_v27  ;;  %v989_v35 = vpop.f32.mrf.mxu1  ;;  %v3926_v59 = vadd.f32 %v960_v47, %v3820_v50 }
 0x124   : > { %v1173_v62 = vadd.f32 %v1133_v61, %v3816_v22  ;;  %v3929_v0 = vadd.f32 %v989_v35, %v3822_v28 }
 0x12a   : > { %v1164_v42 = vpop.f32.mrf.mxu3  ;;  %v1313_v30 = vpop.f32.mrf.mxu0 }
 0x12b   : > { %v1135_v1 = vpop.f32.mrf.mxu2  ;;  %v3933_v60 = vadd.f32 %v1164_v42, %v3828_v39  ;;  %v1342_v22 = vpop.f32.mrf.mxu1 }
 0x12c   : > { %v1174_v43 = vadd.f32 %v1135_v1, %v3826_v38  ;;  %v1370_v27 = vadd.f32 %v1342_v22, %v3841_v10 }
 0x12d   : > { %4116 = vst [vmem:[#allocation2_spill] sm:$0xff] %v3933_v60 }
 0x132   : > { %v1537_v48 = vpop.f32.mrf.mxu3  ;;  %v1315_v11 = vpop.f32.mrf.mxu0 }
 0x133   : > { %v1508_v19 = vpop.f32.mrf.mxu2  ;;  %v1344_v14 = vpop.f32.mrf.mxu1 }
 0x134   : > { %v3937_v50 = vadd.f32 %v1344_v14, %v3853_v20  ;;  %v1557_v14 = vadd.f32 %v1508_v19, %v3838_v7 }
 0x13a   : > { %v1539_v52 = vpop.f32.mrf.mxu3  ;;  %v1318_v4 = vpop.f32.mrf.mxu0 }
 0x13b   : > { %v1510_v28 = vpop.f32.mrf.mxu2  ;;  %v1347_v44 = vpop.f32.mrf.mxu1 }
 0x13c   : > { %v3940_v38 = vadd.f32 %v1347_v44, %v3869_v33  ;;  %v1558_v19 = vadd.f32 %v1510_v28, %v3850_v58  ;;  %v1566_v58 = vadd.f32 %v1539_v52, %v3856_v55 }
 0x142   : > { %v3942_v54 = vpop.f32.mrf.mxu3  ;;  %v3944_v18 = vpop.f32.mrf.mxu0 }
 0x143   : > { %v1513_v39 = vpop.f32.mrf.mxu2  ;;  %v1349_v10 = vpop.f32.mrf.mxu1 }
 0x144   : > { %v3947_v53 = vadd.f32 %v1349_v10, %v3882_v45 }
 0x14a   : > { %v3951_v20 = vpop.f32.mrf.mxu3  ;;  %v3953_v8 = vpop.f32.mrf.mxu0 }
 0x14b   : > { %v3949_v23 = vpop.f32.mrf.mxu2  ;;  %v1352_v21 = vpop.f32.mrf.mxu1 }
 0x14c   : > { %v3955_v9 = vadd.f32 %v1352_v21, %v1171_v6 }
 0x152   : > { %v3959_v12 = vpop.f32.mrf.mxu3  ;;  %v3961_v37 = vpop.f32.mrf.mxu0 }
 0x153   : > { %v3957_v33 = vpop.f32.mrf.mxu2  ;;  %v1354_v29 = vpop.f32.mrf.mxu1 }
 0x154   : > { %v3963_v3 = vadd.f32 %v1354_v29, %v1172_v51  ;;  %v1362_v51 = vadd.f32 %v1313_v30, %v3835_v2  ;;  %v1363_v30 = vadd.f32 %v1315_v11, %v3847_v57  ;;  %v1559_v11 = vadd.f32 %v1513_v39, %v3866_v13 }
 0x155   : > { %v1560_v39 = vadd.f32 %v3949_v23, %v3878_v32  ;;  %v1568_v23 = vadd.f32 %v3951_v20, %v3885_v46 }
 0x15a   : > { %v3967_v26 = vpop.f32.mrf.mxu3  ;;  %v3969_v61 = vpop.f32.mrf.mxu0 }
 0x15b   : > { %v3965_v45 = vpop.f32.mrf.mxu2  ;;  %v1357_v5 = vpop.f32.mrf.mxu1 }
 0x15c   : > { %v3971_v47 = vadd.f32 %v1357_v5, %v1173_v62  ;;  %v3991_v62 = vld [vmem:[%s4114_s4] ss:$0 sm:$0xff] }
 0x162   : > { %v3975_v35 = vpop.f32.mrf.mxu3  ;;  %v3977_v1 = vpop.f32.mrf.mxu0 }
 0x163   : > { %v3973_v6 = vpop.f32.mrf.mxu2  ;;  %v1359_v42 = vpop.f32.mrf.mxu1 }
 0x164   : > { %v3979_v22 = vadd.f32 %v1359_v42, %v1174_v43  ;;  %v1565_v43 = vadd.f32 %v1537_v48, %v3844_v49 }
 0x166   : > { %4117 = vst [vmem:[#allocation3_spill] sm:$0xff] %v3979_v22 }
 0x16a   : > { %v3986_v10 = vpop.f32.mrf.mxu3  ;;  %v1656_v21 = vpop.f32.mrf.mxu0 }
 0x16b   : > { %v3984_v44 = vpop.f32.mrf.mxu2  ;;  %v1768_v29 = vpop.f32.mrf.mxu1  ;;  %v1676_v5 = vadd.f32 %v1656_v21, %v1362_v51 }
 0x16c   : > { %v1788_v60 = vadd.f32 %v1768_v29, %v1557_v14 }
 0x16d   : > { %v2012_v2 = vadd.f32 %v3991_v62, %v1676_v5 }
 0x16e   : > { %v2028_v7 = vadd.f32 %v3991_v62, %v1788_v60 }
 0x16f   : > { %2020 = vst [vmem:[%s3996_s19] sm:$0xff] %v2012_v2 }
 0x170   : > { %2750 = vst [vmem:[%s3996_s19 + $0x40] sm:$0xff] %v2028_v7 }
 0x172   : > { %v1980_v51 = vpop.f32.mrf.mxu3  ;;  %v1658_v29 = vpop.f32.mrf.mxu0 }
 0x173   : > { %v1874_v42 = vpop.f32.mrf.mxu2  ;;  %v2000_v21 = vadd.f32 %v1980_v51, %v1565_v43  ;;  %v1770_v5 = vpop.f32.mrf.mxu1  ;;  %v1677_v22 = vadd.f32 %v1658_v29, %v1363_v30 }
 0x174   : > { %v1894_v14 = vadd.f32 %v1874_v42, %v1370_v27  ;;  %v1789_v60 = vadd.f32 %v1770_v5, %v1558_v19  ;;  %v1364_v27 = vadd.f32 %v1318_v4, %v3863_v56  ;;  %v1567_v4 = vadd.f32 %v3942_v54, %v3872_v24 }
 0x175   : > { %v2062_v49 = vadd.f32 %v3991_v62, %v2000_v21  ;;  %v2013_v48 = vadd.f32 %v3991_v62, %v1677_v22 }
 0x176   : > { %v2045_v2 = vadd.f32 %v3991_v62, %v1894_v14  ;;  %v2029_v57 = vadd.f32 %v3991_v62, %v1789_v60 }
 0x177   : > { %2766 = vst [vmem:[%s3996_s19 + $0xc0] sm:$0xff] %v2062_v49 }
 0x178   : > { %2758 = vst [vmem:[%s3996_s19 + $0x80] sm:$0xff] %v2045_v2 }
 0x179   : > { %2021 = vst [vmem:[%s3996_s19 + $0x8] sm:$0xff] %v2013_v48  ;;  %v1561_v48 = vadd.f32 %v3957_v33, %v3895_v16  ;;  %v1569_v33 = vadd.f32 %v3959_v12, %v3901_v17 }
 0x17a   : > { %2751 = vst [vmem:[%s3996_s19 + $0x48] sm:$0xff] %v2029_v57  ;;  %v1982_v7 = vpop.f32.mrf.mxu3  ;;  %v1661_v30 = vpop.f32.mrf.mxu0 }
 0x17b   : > { %v1876_v28 = vpop.f32.mrf.mxu2  ;;  %v2001_v22 = vadd.f32 %v1982_v7, %v1566_v58  ;;  %v1773_v19 = vpop.f32.mrf.mxu1  ;;  %v1678_v42 = vadd.f32 %v1661_v30, %v1364_v27 }
 0x17c   : > { %v1895_v43 = vadd.f32 %v1876_v28, %v3937_v50  ;;  %v1790_v51 = vadd.f32 %v1773_v19, %v1559_v11  ;;  %v1365_v50 = vadd.f32 %v3944_v18, %v3875_v31 }
 0x17d   : > { %v2063_v52 = vadd.f32 %v3991_v62, %v2001_v22  ;;  %v2014_v56 = vadd.f32 %v3991_v62, %v1678_v42  ;;  %v1562_v22 = vadd.f32 %v3965_v45, %v3907_v15  ;;  %v1570_v45 = vadd.f32 %v3967_v26, %v3911_v36 }
 0x17e   : > { %v2046_v55 = vadd.f32 %v3991_v62, %v1895_v43  ;;  %v2030_v13 = vadd.f32 %v3991_v62, %v1790_v51 }
 0x17f   : > { %2767 = vst [vmem:[%s3996_s19 + $0xc8] sm:$0xff] %v2063_v52 }
 0x180   : > { %2759 = vst [vmem:[%s3996_s19 + $0x88] sm:$0xff] %v2046_v55 }
 0x181   : > { %2022 = vst [vmem:[%s3996_s19 + $0x10] sm:$0xff] %v2014_v56 }
 0x182   : > { %2752 = vst [vmem:[%s3996_s19 + $0x50] sm:$0xff] %v2030_v13  ;;  %v1985_v21 = vpop.f32.mrf.mxu3  ;;  %v1663_v60 = vpop.f32.mrf.mxu0  ;;  %v1563_v13 = vadd.f32 %v3973_v6, %v3919_v41  ;;  %v1571_v6 = vadd.f32 %v3975_v35, %v3923_v34 }
 0x183   : > { %v1879_v14 = vpop.f32.mrf.mxu2  ;;  %v2002_v5 = vadd.f32 %v1985_v21, %v1567_v4  ;;  %v1775_v2 = vpop.f32.mrf.mxu1  ;;  %v1679_v24 = vadd.f32 %v1663_v60, %v1365_v50  ;;  %v1564_v60 = vadd.f32 %v3984_v44, %v3929_v0  ;;  %v4118_v44 = vld [vmem:[#allocation2_spill] sm:$0xff] }
 0x184   : > { %v1896_v29 = vadd.f32 %v1879_v14, %v3940_v38  ;;  %v1791_v54 = vadd.f32 %v1775_v2, %v1560_v39  ;;  %v1366_v38 = vadd.f32 %v3953_v8, %v3892_v63 }
 0x185   : > { %v2064_v31 = vadd.f32 %v3991_v62, %v2002_v5  ;;  %v2015_v18 = vadd.f32 %v3991_v62, %v1679_v24 }
 0x186   : > { %v2047_v49 = vadd.f32 %v3991_v62, %v1896_v29  ;;  %v2031_v32 = vadd.f32 %v3991_v62, %v1791_v54 }
 0x187   : > { %2768 = vst [vmem:[%s3996_s19 + $0xd0] sm:$0xff] %v2064_v31 }
 0x188   : > { %2760 = vst [vmem:[%s3996_s19 + $0x90] sm:$0xff] %v2047_v49 }
 0x189   : > { %2023 = vst [vmem:[%s3996_s19 + $0x18] sm:$0xff] %v2015_v18 }
 0x18a   : > { %2753 = vst [vmem:[%s3996_s19 + $0x58] sm:$0xff] %v2031_v32  ;;  %v1987_v58 = vpop.f32.mrf.mxu3  ;;  %v1666_v28 = vpop.f32.mrf.mxu0 }
 0x18b   : > { %v1881_v57 = vpop.f32.mrf.mxu2  ;;  %v2003_v11 = vadd.f32 %v1987_v58, %v1568_v23  ;;  %v1778_v7 = vpop.f32.mrf.mxu1  ;;  %v1680_v46 = vadd.f32 %v1666_v28, %v1366_v38 }
 0x18c   : > { %v1897_v27 = vadd.f32 %v1881_v57, %v3947_v53  ;;  %v1792_v20 = vadd.f32 %v1778_v7, %v1561_v48  ;;  %v1367_v53 = vadd.f32 %v3961_v37, %v3904_v25  ;;  %v4119_v48 = vld [vmem:[#allocation3_spill] sm:$0xff] }
 0x18d   : > { %v2065_v63 = vadd.f32 %v3991_v62, %v2003_v11  ;;  %v2016_v8 = vadd.f32 %v3991_v62, %v1680_v46 }
 0x18e   : > { %v2048_v43 = vadd.f32 %v3991_v62, %v1897_v27  ;;  %v2032_v16 = vadd.f32 %v3991_v62, %v1792_v20 }
 0x18f   : > { %2769 = vst [vmem:[%s3996_s19 + $0xd8] sm:$0xff] %v2065_v63 }
 0x190   : > { %2761 = vst [vmem:[%s3996_s19 + $0x98] sm:$0xff] %v2048_v43 }
 0x191   : > { %2024 = vst [vmem:[%s3996_s19 + $0x20] sm:$0xff] %v2016_v8 }
 0x192   : > { %2754 = vst [vmem:[%s3996_s19 + $0x60] sm:$0xff] %v2032_v16  ;;  %v1990_v19 = vpop.f32.mrf.mxu3  ;;  %v1668_v55 = vpop.f32.mrf.mxu0 }
 0x193   : > { %v1884_v30 = vpop.f32.mrf.mxu2  ;;  %v2004_v51 = vadd.f32 %v1990_v19, %v1569_v33  ;;  %v1780_v52 = vpop.f32.mrf.mxu1  ;;  %v1681_v17 = vadd.f32 %v1668_v55, %v1367_v53 }
 0x194   : > { %v1898_v42 = vadd.f32 %v1884_v30, %v3955_v9  ;;  %v1793_v12 = vadd.f32 %v1780_v52, %v1562_v22  ;;  %v1368_v9 = vadd.f32 %v3969_v61, %v3916_v40 }
 0x195   : > { %v2066_v25 = vadd.f32 %v3991_v62, %v2004_v51  ;;  %v2017_v37 = vadd.f32 %v3991_v62, %v1681_v17 }
 0x196   : > { %v2049_v56 = vadd.f32 %v3991_v62, %v1898_v42  ;;  %v2033_v15 = vadd.f32 %v3991_v62, %v1793_v12 }
 0x197   : > { %2770 = vst [vmem:[%s3996_s19 + $0xe0] sm:$0xff] %v2066_v25 }
 0x198   : > { %2762 = vst [vmem:[%s3996_s19 + $0xa0] sm:$0xff] %v2049_v56 }
 0x199   : > { %2025 = vst [vmem:[%s3996_s19 + $0x28] sm:$0xff] %v2017_v37 }
 0x19a   : > { %2755 = vst [vmem:[%s3996_s19 + $0x68] sm:$0xff] %v2033_v15  ;;  %v1992_v50 = vpop.f32.mrf.mxu3  ;;  %v1671_v21 = vpop.f32.mrf.mxu0 }
 0x19b   : > { %v1886_v4 = vpop.f32.mrf.mxu2  ;;  %v2005_v14 = vadd.f32 %v1992_v50, %v1570_v45  ;;  %v1783_v29 = vpop.f32.mrf.mxu1  ;;  %v1682_v36 = vadd.f32 %v1671_v21, %v1368_v9 }
 0x19c   : > { %v1899_v39 = vadd.f32 %v1886_v4, %v3963_v3  ;;  %v1794_v26 = vadd.f32 %v1783_v29, %v1563_v13  ;;  %v1369_v3 = vadd.f32 %v3977_v1, %v3926_v59 }
 0x19d   : > { %v2067_v40 = vadd.f32 %v3991_v62, %v2005_v14  ;;  %v2018_v61 = vadd.f32 %v3991_v62, %v1682_v36 }
 0x19e   : > { %v2050_v5 = vadd.f32 %v3991_v62, %v1899_v39  ;;  %v2034_v41 = vadd.f32 %v3991_v62, %v1794_v26 }
 0x19f   : > { %2771 = vst [vmem:[%s3996_s19 + $0xe8] sm:$0xff] %v2067_v40 }
 0x1a0   : > { %2763 = vst [vmem:[%s3996_s19 + $0xa8] sm:$0xff] %v2050_v5 }
 0x1a1   : > { %2026 = vst [vmem:[%s3996_s19 + $0x30] sm:$0xff] %v2018_v61 }
 0x1a2   : > { %2756 = vst [vmem:[%s3996_s19 + $0x70] sm:$0xff] %v2034_v41  ;;  %v1995_v24 = vpop.f32.mrf.mxu3  ;;  %v1673_v31 = vpop.f32.mrf.mxu0 }
 0x1a3   : > { %v1889_v2 = vpop.f32.mrf.mxu2  ;;  %v2006_v49 = vadd.f32 %v1995_v24, %v1571_v6  ;;  %v1785_v18 = vpop.f32.mrf.mxu1  ;;  %v1683_v34 = vadd.f32 %v1673_v31, %v1369_v3 }
 0x1a4   : > { %v1900_v54 = vadd.f32 %v1889_v2, %v3971_v47  ;;  %v1795_v35 = vadd.f32 %v1785_v18, %v1564_v60  ;;  %v1572_v47 = vadd.f32 %v3986_v10, %v4118_v44 }
 0x1a5   : > { %v2068_v59 = vadd.f32 %v3991_v62, %v2006_v49  ;;  %v2019_v0 = vadd.f32 %v3991_v62, %v1683_v34 }
 0x1a6   : > { %v2051_v32 = vadd.f32 %v3991_v62, %v1900_v54  ;;  %v2035_v1 = vadd.f32 %v3991_v62, %v1795_v35 }
 0x1a7   : > { %2772 = vst [vmem:[%s3996_s19 + $0xf0] sm:$0xff] %v2068_v59 }
 0x1a8   : > { %2764 = vst [vmem:[%s3996_s19 + $0xb0] sm:$0xff] %v2051_v32 }
 0x1a9   : > { %2027 = vst [vmem:[%s3996_s19 + $0x38] sm:$0xff] %v2019_v0 }
 0x1aa   : > { %2757 = vst [vmem:[%s3996_s19 + $0x78] sm:$0xff] %v2035_v1  ;;  %v1997_v38 = vpop.f32.mrf.mxu3 }
 0x1ab   : > { %v1891_v23 = vpop.f32.mrf.mxu2  ;;  %v2007_v58 = vadd.f32 %v1997_v38, %v1572_v47 }
 0x1ac   : > { %v1901_v57 = vadd.f32 %v1891_v23, %v4119_v48 }
 0x1ad   : > { %v2069_v11 = vadd.f32 %v3991_v62, %v2007_v58 }
 0x1ae   : > { %v2052_v27 = vadd.f32 %v3991_v62, %v1901_v57 }
 0x1af   : > { %2773 = vst [vmem:[%s3996_s19 + $0xf8] sm:$0xff] %v2069_v11 }
 0x1b0   : > { %2765 = vst [vmem:[%s3996_s19 + $0xb8] sm:$0xff] %v2052_v27 }
 0x1b1 PF: > { %s15_s18 = sadd.s32 1, %s2921_s18  }
 0x1b2   : > { %p12_p4 = scmp.ge.s32.totalorder %s15_s18, 4  }
 0x1b4   :  { %14 = sbr.rel (!%p12_p4) target bundleno = 1 (0x1), region = 79 }

</bundles_post_ra>
